<compile_context>
chip_gen: v5e
topology: v5e:2x2
jax: 0.10.0
libtpu: 0.0.40
codegen_flags: <defaults>
</compile_context>

<pallas_src>
import math

import jax
import jax.numpy as jnp
import numpy as np
from jax.experimental import pallas as pl
from jax.experimental.pallas import tpu as pltpu

# ------------------------- RatSpnConfig (synthetic, deterministic) -------------------------
F = 16          # in_features
D = 2           # tree depth
S = 4           # sum nodes per layer
I = 4           # leaf distributions per scope
R = 2           # repetitions
C = 3           # root heads / classes
MIN_SIGMA, MAX_SIGMA = 1e-2, 2.0   # RatNormal leaf_base_kwargs

G = 2 ** D                        # number of scopes after the leaf Product layer
CARD = int(math.ceil(F / G))      # IndependentMultivariate cardinality
LOG2PI = math.log(2.0 * math.pi)
N_SUM_LAYERS = D - 1
OUT_ROWS = ((C + 7) // 8) * 8     # pad output sublanes to a full tile (unmasked stores)


# ------------------------------------ Pallas kernel ------------------------------------
def make_ratspn_kernel(n_sum_layers):
    def kernel(x_ref, a_ref, b_ref, c_ref, *rest):
        wbd_refs = rest[0:n_sum_layers]
        pair_refs = rest[n_sum_layers:2 * n_sum_layers]
        pb_refs = rest[2 * n_sum_layers:3 * n_sum_layers]
        wroot_ref = rest[3 * n_sum_layers]
        out_ref = rest[3 * n_sum_layers + 1]

        x = x_ref[...]                                                    # (F, TN), batch in lanes
        tn = x.shape[-1]

        # --- RatNormal leaf + IndependentMultivariate Product + first CrossProduct ---
        # log-pdf is quadratic in x; scope sums / channel pairing are linear in the log-pdfs,
        # so the whole front-end collapses to two small MXU contractions over K = F.
        z = (jnp.dot(a_ref[...], x * x, preferred_element_type=jnp.float32)
             + jnp.dot(b_ref[...], x, preferred_element_type=jnp.float32)
             + c_ref[...])                                                # (R*(G//2)*I*I, TN)

        dl = G // 2
        cin = I * I
        for li in range(n_sum_layers):                                    # static unroll
            groups = R * dl
            z3 = z.reshape(groups, cin, tn)                               # cin % 8 == 0 -> free relayout
            m = jnp.max(z3, axis=1)                                       # (groups, TN) per-group max
            e = jnp.exp(z3 - m[:, None, :]).reshape(groups * cin, tn)
            # Sum layer: one block-diagonal softmaxed-weight MXU dot
            acc = jnp.dot(wbd_refs[li][...], e,
                          preferred_element_type=jnp.float32)             # (groups*S, TN)
            # weighted-LSE finalize + CrossProduct in one go:
            #   pair @ (bcast@m + log(acc)) = (pair@bcast) @ m + pair @ log(acc)
            z = (jnp.dot(pair_refs[li][...], jnp.log(acc),
                         preferred_element_type=jnp.float32)
                 + jnp.dot(pb_refs[li][...], m,
                           preferred_element_type=jnp.float32))           # (R*(dl//2)*S*S, TN)
            dl //= 2
            cin = S * S

        # --- root Sum: mixture over all repetitions * channels as one MXU dot ---
        m = jnp.max(z, axis=0, keepdims=True)                             # (1, TN)
        e = jnp.exp(z - m)
        acc = jnp.dot(wroot_ref[...], e,
                      preferred_element_type=jnp.float32)                 # (OUT_ROWS, TN)
        out_ref[...] = (m + jnp.log(acc)).astype(out_ref.dtype)

    return kernel


# ------------------------------------ wrapper / glue ------------------------------------
def _build_constants(perm, mu, sig, w_sums, w_root_torch):
    """All O(params): fold permutation + leaf params + first CrossProduct into (A2, B2, c2);
    build block-diagonal Sum weights, 0/1 pairing matrices and the root weight matrix."""
    mu_np = np.asarray(mu, np.float64)
    sig_np = np.asarray(sig, np.float64)
    perm_np = np.asarray(perm)

    isig2 = 1.0 / (sig_np ** 2)
    a_coef = -0.5 * isig2                                                # (R, I, F)
    b_coef = mu_np * isig2
    c_coef = -0.5 * mu_np ** 2 * isig2 - np.log(sig_np) - 0.5 * LOG2PI

    g2 = G // 2
    rows = R * g2 * I * I
    A2 = np.zeros((rows, F), np.float64)
    B2 = np.zeros((rows, F), np.float64)
    c2 = np.zeros((rows, 1), np.float64)
    for r in range(R):
        for d in range(g2):
            for i in range(I):
                for j in range(I):
                    row = ((r * g2 + d) * I + i) * I + j
                    for (g, ch) in ((2 * d, i), (2 * d + 1, j)):         # left / right scope
                        lo, hi = g * CARD, min((g + 1) * CARD, F)        # padded region contributes 0
                        for f in range(lo, hi):
                            col = perm_np[f, r]                          # fold _randomize permutation
                            A2[row, col] += a_coef[r, ch, f]
                            B2[row, col] += b_coef[r, ch, f]
                            c2[row, 0] += c_coef[r, ch, f]

    wbd_list, pair_list, pb_list = [], [], []
    dl, cin = g2, I * I
    for li in range(N_SUM_LAYERS):
        groups = R * dl
        probs = np.asarray(jax.nn.softmax(w_sums[li], axis=2), np.float64)     # (R, dl, cin, S)
        wbd = np.zeros((groups * S, groups * cin), np.float64)
        for r in range(R):
            for d in range(dl):
                g = r * dl + d
                wbd[g * S:(g + 1) * S, g * cin:(g + 1) * cin] = probs[r, d].T  # (S, cin)
        dl2 = dl // 2
        pair = np.zeros((R * dl2 * S * S, groups * S), np.float64)
        for r in range(R):
            for d2 in range(dl2):
                for i in range(S):
                    for j in range(S):
                        row = ((r * dl2 + d2) * S + i) * S + j
                        pair[row, (r * dl + 2 * d2) * S + i] += 1.0
                        pair[row, (r * dl + 2 * d2 + 1) * S + j] += 1.0
        bcast = np.zeros((groups * S, groups), np.float64)
        for g in range(groups):
            bcast[g * S:(g + 1) * S, g] = 1.0
        wbd_list.append(jnp.asarray(wbd, jnp.float32))
        pair_list.append(jnp.asarray(pair, jnp.float32))
        pb_list.append(jnp.asarray(pair @ bcast, jnp.float32))
        dl, cin = dl2, S * S

    cin_final = S * S if N_SUM_LAYERS > 0 else I * I
    K = R * cin_final
    probs_root = np.asarray(jax.nn.softmax(w_root_torch, axis=0), np.float64)  # (K, C), k = c*R + r
    probs_root_t = (probs_root.reshape(cin_final, R, C)
                    .transpose(1, 0, 2).reshape(R * cin_final, C).T)           # (C, K), col = r*cin + c
    wroot_pad = np.full((OUT_ROWS, K), 1.0 / K, np.float64)                    # padded rows stay finite
    wroot_pad[:C] = probs_root_t

    return (jnp.asarray(A2, jnp.float32), jnp.asarray(B2, jnp.float32),
            jnp.asarray(c2, jnp.float32), wbd_list, pair_list, pb_list,
            jnp.asarray(wroot_pad, jnp.float32))


def ratspn_forward(x, perm, mu, sig, w_sums, w_root_torch, *, tn=1024):
    """x: (N, F) float32; perm: (F, R) int; w_root_torch: (R*cin_final, C) in torch channel order
    (k = c*R + r). Returns (N, C) conditional log-likelihoods."""
    n = x.shape[0]
    n_pad = ((n + tn - 1) // tn) * tn
    x_p = jnp.pad(x, ((0, n_pad - n), (0, 0))) if n_pad != n else x
    x_t = x_p.T                                                           # (F, Npad): single transpose, no gathers

    A2, B2, c2, wbd_list, pair_list, pb_list, wroot_pad = _build_constants(
        perm, mu, sig, w_sums, w_root_torch)

    args = [x_t, A2, B2, c2] + wbd_list + pair_list + pb_list + [wroot_pad]

    in_specs = [pl.BlockSpec((F, tn), lambda b: (0, b))]                  # only x is batch-tiled
    for a in args[1:]:
        in_specs.append(pl.BlockSpec(a.shape, lambda b: (0, 0)))          # tiny loop-invariant constants

    out = pl.pallas_call(
        make_ratspn_kernel(N_SUM_LAYERS),
        grid=(n_pad // tn,),
        in_specs=in_specs,
        out_specs=pl.BlockSpec((OUT_ROWS, tn), lambda b: (0, b)),         # lane-dense, full-sublane stores
        out_shape=jax.ShapeDtypeStruct((OUT_ROWS, n_pad), jnp.float32),
        compiler_params=pltpu.CompilerParams(dimension_semantics=("parallel",)),
    )(*args)
    return out[:C, :n].T                                                  # (N, C)


# ------------------------------ pure-JAX reference (torch semantics) ------------------------------
def ratspn_reference(x, perm, mu, sig, w_sums, w_root_torch):
    n = x.shape[0]
    xp = jnp.stack([x[:, perm[:, r]] for r in range(R)], axis=-1)            # (N, F, R)
    mu_t = jnp.transpose(mu, (2, 1, 0))                                       # (F, I, R)
    sig_t = jnp.transpose(sig, (2, 1, 0))
    ll = (-0.5 * ((xp[:, :, None, :] - mu_t[None]) / sig_t[None]) ** 2
          - jnp.log(sig_t)[None] - 0.5 * LOG2PI)                              # (N, F, I, R)
    pad = G * CARD - F
    if pad:
        ll = jnp.pad(ll, ((0, 0), (0, pad), (0, 0), (0, 0)))
    z = ll.reshape(n, G, CARD, I, R).sum(axis=2)                              # (N, G, I, R)

    def crossprod(t):
        n_, dl, cc, r_ = t.shape
        left = t[:, 0::2][:, :, :, None, :]
        right = t[:, 1::2][:, :, None, :, :]
        return (left + right).reshape(n_, dl // 2, cc * cc, r_)

    z = crossprod(z)
    for li in range(N_SUM_LAYERS):
        logw = jax.nn.log_softmax(w_sums[li], axis=2)                         # (R, Dl, cin, S)
        logw = jnp.transpose(logw, (1, 2, 3, 0))                              # (Dl, cin, S, R)
        z = jax.scipy.special.logsumexp(z[:, :, :, None, :] + logw[None], axis=2)
        z = crossprod(z)
    u = z.reshape(n, -1)                                                      # k = c*R + r (torch view)
    logw_root = jax.nn.log_softmax(w_root_torch, axis=0)                      # (K, C)
    return jax.scipy.special.logsumexp(u[:, :, None] + logw_root[None], axis=1)


# ----------------------------------------- main -----------------------------------------
if __name__ == "__main__":
    N = 2048
    key = jax.random.PRNGKey(0)
    keys = jax.random.split(key, 8)

    # RatNormal leaf parameters (deterministic synthetic init)
    mu = jax.random.normal(keys[0], (R, I, F), jnp.float32)
    raw_sig = jax.random.uniform(keys[1], (R, I, F), jnp.float32)
    sig = MIN_SIGMA + (MAX_SIGMA - MIN_SIGMA) * jax.nn.sigmoid(raw_sig)

    # Inner Sum-layer weights (truncated-normal, std 0.5)
    w_sums = []
    kiter = keys[2]
    cin = I * I
    for li in range(N_SUM_LAYERS):
        dl = 2 ** (D - 1 - li)
        kiter, ksub = jax.random.split(kiter)
        w_sums.append(0.5 * jax.random.truncated_normal(ksub, -2.0, 2.0, (R, dl, cin, S), jnp.float32))
        cin = S * S

    # Root Sum weights in torch channel order (k = c*R + r)
    K = R * cin
    w_root_torch = 0.5 * jax.random.truncated_normal(keys[3], -2.0, 2.0, (K, C), jnp.float32)

    # Per-repetition random feature permutations (rand_indices)
    perm_cols = []
    kp = keys[4]
    for r in range(R):
        kp, ksub = jax.random.split(kp)
        perm_cols.append(jax.random.permutation(ksub, F))
    perm = jnp.stack(perm_cols, axis=1)                                       # (F, R)

    x = jax.random.normal(keys[5], (N, F), jnp.float32)                       # (batch, in_features)

    out = ratspn_forward(x, perm, mu, sig, w_sums, w_root_torch, tn=1024)
    out = jax.block_until_ready(out)

    ref = ratspn_reference(x, perm, mu, sig, w_sums, w_root_torch)
    assert out.shape == (N, C)
    np.testing.assert_allclose(np.asarray(out), np.asarray(ref), rtol=1e-4, atol=1e-3)

    print("KERNEL_OK")
</pallas_src>

<mosaic_0001>
module attributes {stable_mosaic.version = 11 : i64} {
  func.func @kernel(%arg0: i32, %arg1: memref<16x1024xf32, #tpu.memory_space<vmem>>, %arg2: memref<64x16xf32, #tpu.memory_space<vmem>>, %arg3: memref<64x16xf32, #tpu.memory_space<vmem>>, %arg4: memref<64x1xf32, #tpu.memory_space<vmem>>, %arg5: memref<16x64xf32, #tpu.memory_space<vmem>>, %arg6: memref<32x16xf32, #tpu.memory_space<vmem>>, %arg7: memref<32x4xf32, #tpu.memory_space<vmem>>, %arg8: memref<8x32xf32, #tpu.memory_space<vmem>>, %arg9: memref<8x1024xf32, #tpu.memory_space<vmem>>) attributes {dimension_semantics = [#tpu.dimension_semantics<parallel>], iteration_bounds = array<i64: 2>, scalar_prefetch = 0 : i64, scratch_operands = 0 : i64, tpu.core_type = #tpu.core_type<tc>, window_params = [{transform_indices = @transform_0, window_bounds = array<i64: 16, 1024>}, {pipeline_mode = #tpu.pipeline_mode<synchronous>, transform_indices = @transform_1, window_bounds = array<i64: 64, 16>}, {pipeline_mode = #tpu.pipeline_mode<synchronous>, transform_indices = @transform_2, window_bounds = array<i64: 64, 16>}, {pipeline_mode = #tpu.pipeline_mode<synchronous>, transform_indices = @transform_3, window_bounds = array<i64: 64, 1>}, {pipeline_mode = #tpu.pipeline_mode<synchronous>, transform_indices = @transform_4, window_bounds = array<i64: 16, 64>}, {pipeline_mode = #tpu.pipeline_mode<synchronous>, transform_indices = @transform_5, window_bounds = array<i64: 32, 16>}, {pipeline_mode = #tpu.pipeline_mode<synchronous>, transform_indices = @transform_6, window_bounds = array<i64: 32, 4>}, {pipeline_mode = #tpu.pipeline_mode<synchronous>, transform_indices = @transform_7, window_bounds = array<i64: 8, 32>}, {transform_indices = @transform_8, window_bounds = array<i64: 8, 1024>}]} {
    %c0 = arith.constant 0 : index
    %c0_0 = arith.constant 0 : index
    %0 = vector.load %arg1[%c0, %c0_0] : memref<16x1024xf32, #tpu.memory_space<vmem>>, vector<16x1024xf32>
    %c0_1 = arith.constant 0 : index
    %c0_2 = arith.constant 0 : index
    %1 = vector.load %arg2[%c0_1, %c0_2] : memref<64x16xf32, #tpu.memory_space<vmem>>, vector<64x16xf32>
    %2 = arith.mulf %0, %0 : vector<16x1024xf32>
    %cst = arith.constant dense<0.000000e+00> : vector<64x1024xf32>
    %3 = tpu.matmul %1, %2, %cst {dimension_numbers = #tpu.dot_dimension_numbers<[1], [0], [0], [1], [0, 0, 1, 1], [], []>} : vector<64x16xf32>, vector<16x1024xf32>, vector<64x1024xf32> -> vector<64x1024xf32>
    %c0_3 = arith.constant 0 : index
    %c0_4 = arith.constant 0 : index
    %4 = vector.load %arg3[%c0_3, %c0_4] : memref<64x16xf32, #tpu.memory_space<vmem>>, vector<64x16xf32>
    %cst_5 = arith.constant dense<0.000000e+00> : vector<64x1024xf32>
    %5 = tpu.matmul %4, %0, %cst_5 {dimension_numbers = #tpu.dot_dimension_numbers<[1], [0], [0], [1], [0, 0, 1, 1], [], []>} : vector<64x16xf32>, vector<16x1024xf32>, vector<64x1024xf32> -> vector<64x1024xf32>
    %6 = arith.addf %3, %5 : vector<64x1024xf32>
    %c0_6 = arith.constant 0 : index
    %c0_7 = arith.constant 0 : index
    %7 = vector.load %arg4[%c0_6, %c0_7] : memref<64x1xf32, #tpu.memory_space<vmem>>, vector<64x1xf32>
    %8 = vector.broadcast %7 : vector<64x1xf32> to vector<64x1024xf32>
    %9 = arith.addf %6, %8 : vector<64x1024xf32>
    %10 = vector.shape_cast %9 : vector<64x1024xf32> to vector<4x16x1024xf32>
    %cst_8 = arith.constant dense<0xFF800000> : vector<4x1024xf32>
    %11 = vector.multi_reduction <maximumf>, %10, %cst_8 [1] : vector<4x16x1024xf32> to vector<4x1024xf32>
    %12 = vector.shape_cast %11 : vector<4x1024xf32> to vector<4x1x1024xf32>
    %13 = vector.broadcast %12 : vector<4x1x1024xf32> to vector<4x16x1024xf32>
    %14 = arith.subf %10, %13 : vector<4x16x1024xf32>
    %15 = math.exp %14 : vector<4x16x1024xf32>
    %16 = vector.shape_cast %15 : vector<4x16x1024xf32> to vector<64x1024xf32>
    %c0_9 = arith.constant 0 : index
    %c0_10 = arith.constant 0 : index
    %17 = vector.load %arg5[%c0_9, %c0_10] : memref<16x64xf32, #tpu.memory_space<vmem>>, vector<16x64xf32>
    %cst_11 = arith.constant dense<0.000000e+00> : vector<16x1024xf32>
    %18 = tpu.matmul %17, %16, %cst_11 {dimension_numbers = #tpu.dot_dimension_numbers<[1], [0], [0], [1], [0, 0, 1, 1], [], []>} : vector<16x64xf32>, vector<64x1024xf32>, vector<16x1024xf32> -> vector<16x1024xf32>
    %c0_12 = arith.constant 0 : index
    %c0_13 = arith.constant 0 : index
    %19 = vector.load %arg6[%c0_12, %c0_13] : memref<32x16xf32, #tpu.memory_space<vmem>>, vector<32x16xf32>
    %20 = math.log %18 : vector<16x1024xf32>
    %cst_14 = arith.constant dense<0.000000e+00> : vector<32x1024xf32>
    %21 = tpu.matmul %19, %20, %cst_14 {dimension_numbers = #tpu.dot_dimension_numbers<[1], [0], [0], [1], [0, 0, 1, 1], [], []>} : vector<32x16xf32>, vector<16x1024xf32>, vector<32x1024xf32> -> vector<32x1024xf32>
    %c0_15 = arith.constant 0 : index
    %c0_16 = arith.constant 0 : index
    %22 = vector.load %arg7[%c0_15, %c0_16] : memref<32x4xf32, #tpu.memory_space<vmem>>, vector<32x4xf32>
    %cst_17 = arith.constant dense<0.000000e+00> : vector<32x1024xf32>
    %23 = tpu.matmul %22, %11, %cst_17 {dimension_numbers = #tpu.dot_dimension_numbers<[1], [0], [0], [1], [0, 0, 1, 1], [], []>} : vector<32x4xf32>, vector<4x1024xf32>, vector<32x1024xf32> -> vector<32x1024xf32>
    %24 = arith.addf %21, %23 : vector<32x1024xf32>
    %cst_18 = arith.constant dense<0xFF800000> : vector<1024xf32>
    %25 = vector.multi_reduction <maximumf>, %24, %cst_18 [0] : vector<32x1024xf32> to vector<1024xf32>
    %26 = vector.shape_cast %25 : vector<1024xf32> to vector<1x1024xf32>
    %27 = vector.broadcast %26 : vector<1x1024xf32> to vector<32x1024xf32>
    %28 = arith.subf %24, %27 : vector<32x1024xf32>
    %29 = math.exp %28 : vector<32x1024xf32>
    %c0_19 = arith.constant 0 : index
    %c0_20 = arith.constant 0 : index
    %30 = vector.load %arg8[%c0_19, %c0_20] : memref<8x32xf32, #tpu.memory_space<vmem>>, vector<8x32xf32>
    %cst_21 = arith.constant dense<0.000000e+00> : vector<8x1024xf32>
    %31 = tpu.matmul %30, %29, %cst_21 {dimension_numbers = #tpu.dot_dimension_numbers<[1], [0], [0], [1], [0, 0, 1, 1], [], []>} : vector<8x32xf32>, vector<32x1024xf32>, vector<8x1024xf32> -> vector<8x1024xf32>
    %32 = math.log %31 : vector<8x1024xf32>
    %33 = vector.broadcast %26 : vector<1x1024xf32> to vector<8x1024xf32>
    %34 = arith.addf %33, %32 : vector<8x1024xf32>
    %c0_22 = arith.constant 0 : index
    %c0_23 = arith.constant 0 : index
    %35 = vector.load %arg9[%c0_22, %c0_23] : memref<8x1024xf32, #tpu.memory_space<vmem>>, vector<8x1024xf32>
    tpu.vector_store %arg9[%c0_22, %c0_23], %34 {strides = array<i32>} : memref<8x1024xf32, #tpu.memory_space<vmem>>, vector<8x1024xf32>,
    return
  }
  func.func @transform_0(%arg0: i32) -> (i32, i32) {
    %c0_i32 = arith.constant 0 : i32
    %c0_i32_0 = arith.constant 0 : i32
    return %c0_i32, %arg0 : i32, i32
  }
  func.func @transform_1(%arg0: i32) -> (i32, i32) {
    %c0_i32 = arith.constant 0 : i32
    %c0_i32_0 = arith.constant 0 : i32
    %c0_i32_1 = arith.constant 0 : i32
    return %c0_i32, %c0_i32_0 : i32, i32
  }
  func.func @transform_2(%arg0: i32) -> (i32, i32) {
    %c0_i32 = arith.constant 0 : i32
    %c0_i32_0 = arith.constant 0 : i32
    %c0_i32_1 = arith.constant 0 : i32
    return %c0_i32, %c0_i32_0 : i32, i32
  }
  func.func @transform_3(%arg0: i32) -> (i32, i32) {
    %c0_i32 = arith.constant 0 : i32
    %c0_i32_0 = arith.constant 0 : i32
    %c0_i32_1 = arith.constant 0 : i32
    return %c0_i32, %c0_i32_0 : i32, i32
  }
  func.func @transform_4(%arg0: i32) -> (i32, i32) {
    %c0_i32 = arith.constant 0 : i32
    %c0_i32_0 = arith.constant 0 : i32
    %c0_i32_1 = arith.constant 0 : i32
    return %c0_i32, %c0_i32_0 : i32, i32
  }
  func.func @transform_5(%arg0: i32) -> (i32, i32) {
    %c0_i32 = arith.constant 0 : i32
    %c0_i32_0 = arith.constant 0 : i32
    %c0_i32_1 = arith.constant 0 : i32
    return %c0_i32, %c0_i32_0 : i32, i32
  }
  func.func @transform_6(%arg0: i32) -> (i32, i32) {
    %c0_i32 = arith.constant 0 : i32
    %c0_i32_0 = arith.constant 0 : i32
    %c0_i32_1 = arith.constant 0 : i32
    return %c0_i32, %c0_i32_0 : i32, i32
  }
  func.func @transform_7(%arg0: i32) -> (i32, i32) {
    %c0_i32 = arith.constant 0 : i32
    %c0_i32_0 = arith.constant 0 : i32
    %c0_i32_1 = arith.constant 0 : i32
    return %c0_i32, %c0_i32_0 : i32, i32
  }
  func.func @transform_8(%arg0: i32) -> (i32, i32) {
    %c0_i32 = arith.constant 0 : i32
    %c0_i32_0 = arith.constant 0 : i32
    return %c0_i32, %arg0 : i32, i32
  }
}

</mosaic_0001>

<bundles_post_ra>
// kernel: tpu_custom_call.1
= control target key start
LH: loop header
LB: loop body
LE: loop exit
PB: predicated region body
PF: predicated region fallthrough
CT: control target
= control target key end

     0   :  { %13 = vsyncpa [#allocation3], 0  ;;  %s5337_s0 = inlined_call_operand.hbm [shape: f32[16,2048], index: 0, kind: input, shape index: {}]   ;;  %s5338_s1 = inlined_call_operand.vmem [shape: f32[64,16], index: 1, kind: input, shape index: {}]   ;;  %s5339_s2 = inlined_call_operand.vmem [shape: f32[64,16], index: 2, kind: input, shape index: {}]   ;;  %s5340_s3 = inlined_call_operand.vmem [shape: f32[64,1], index: 3, kind: input, shape index: {}]   ;;  %s5341_s4 = inlined_call_operand.vmem [shape: f32[16,64], index: 4, kind: input, shape index: {}]   ;;  %s5342_s5 = inlined_call_operand.vmem [shape: f32[32,16], index: 5, kind: input, shape index: {}]   ;;  %s5343_s6 = inlined_call_operand.vmem [shape: f32[32,4], index: 6, kind: input, shape index: {}]   ;;  %s5344_s7 = inlined_call_operand.vmem [shape: f32[8,32], index: 7, kind: input, shape index: {}]   ;;  %s5345_s8 = inlined_call_operand.hbm [shape: f32[8,2048], index: 8, kind: output, shape index: {}]  }
   0x1   :  { %15 = vsyncpa [#allocation3 + $0x1], 0 }
   0x2   :  { %16 = vsyncpa [#allocation4], 0 }
   0x3   :  { %18 = vsyncpa [#allocation4 + $0x1], 0  ;;  %s3539_s27 = smov 0   ;;  %s3541_s28 = smov 0  }
   0x4   :  { %s3543_s29 = smov 0   ;;  %s3545_s30 = smov 0  }
   0x5 LB: > { %5383 = sst [smem:[#allocation8_spill]] %s3484_s29  ;;  %s3560_s9 = sadd.s32 4294967295, %s3488_s30   ;;  %s3488_s30 = sphi %s3545_s30, %s5530_s30   ;;  %s3484_s29 = sphi %s3543_s29, %s5527_s29   ;;  %s3480_s28 = sphi %s3541_s28, %s5529_s28   ;;  %s3476_s27 = sphi %s3539_s27, %s5528_s27  }
   0x6   : > { %s2859_s10 = sadd.s32 4294967294, %s3488_s30   ;;  %s3564_s11 = sadd.s32 1, %s3488_s30  }
   0x7   : > { %s31_s12 = sadd.s32 1, %s3484_s29  ;;  %s28_s13 = ssub.s32 %s3488_s30, %s3564_s11 }
   0x8   : > { %p38_p0 = scmp.ne.s32.totalorder %s3484_s29, %s3480_s28  ;;  %p29_p1 = scmp.eq.s32.totalorder %s28_s13, 0 }
   0x9   : > { %p39_p2 = scmp.eq.s32.totalorder %s3488_s30, 0  ;;  %p44_p3 = scmp.ne.s32.totalorder %s3480_s28, %s3476_s27 }
   0xa   : > { %p45_p4 = scmp.eq.s32.totalorder %s3560_s9, 0  ;;  %p215_p7 = scmp.eq.s32.totalorder %s3560_s9, 1 }
   0xb   : > { %s3576_s14 = scalar_select %p29_p1, %s3484_s29, %s31_s12  }
   0xc   : > { %p3578_p5 = por %p39_p2, %p38_p0  ;;  %p3582_p6 = por %p45_p4, %p44_p3 }
   0xd   : > { %5384 = sst [smem:[#allocation9_spill]] %s3576_s14  ;;  %p221_p8 = scmp.eq.s32.totalorder %s2859_s10, 1 }
   0xe   : > { %p2861_p9 = scmp.ge.s32.totalorder %s3488_s30, 2  ;;  %p3111_p10 = scmp.lt.s32.totalorder %s3488_s30, 2 }
   0xf   : > { %p3589_p11 = por %p215_p7, %p38_p0  ;;  %p3593_p12 = por %p221_p8, %p44_p3 }
  0x10   : > { %s262_s19 = sand.u32 1, %s3484_s29   ;;  %s3097_s20 = sshll.u32 %s3488_s30, 6 }
  0x11   : > { %s2862_s21 = sshll.u32 %s262_s19, 7  ;;  %s271_s24 = scalar_lea.hbm %s5337_s0, %s3097_s20 }
  0x12   : > { %s272_s25 = sshll.u32 %s271_s24, 4  ;;  %s266_s26 = scalar_lea.vmem [#allocation2], %s2862_s21  ;;  %s273_s25 = int_to_ptr.hbm [resolvable:$true] %s272_s25 }
  0x13   : > { %s274_s10 = sshll.u32 %s266_s26, 4  ;;  %p3604_p13 = pnand %p3111_p10, %p3578_p5  ;;  %s275_s10 = int_to_ptr.vmem [resolvable:$true] %s274_s10 }
  0x14   : > { %p2865_p0 = scmp.ge.s32.totalorder %s3488_s30, 1  ;;  %s263_s13 = scalar_lea.sflag [#allocation3], %s262_s19 }
  0x15   : > { %s3392_s14 = sshra.s32 %s273_s25, 4  ;;  %p3396_p2 = pneg %p3604_p13  ;;  %s3393_s14 = int_to_ptr.hbm [resolvable:$true] %s3392_s14 }
  0x16   : > { %s3394_s29 = scalar_lea.hbm %s3393_s14, 128  ;;  %s3399_s22 = scalar_lea.hbm %s5337_s0, 256 }
  0x17   : > { %p3395_p1 = scmp.ne.s32.totalorder %s3393_s14, %s3394_s29  ;;  %p3400_p5 = scmp.lt.s32.totalorder %s3393_s14, %s5337_s0 }
  0x18   : > { %p3401_p7 = scmp.lt.s32.totalorder %s3399_s22, %s3394_s29 }
  0x19   : > { %p3397_p3 = pnand %p3396_p2, %p3395_p1 }
  0x1a   : > { %p3402_p8 = por %p3401_p7, %p3400_p5 }
  0x1b   : > { %p3398_p4 = pneg %p3397_p3 }
  0x1d   : > { %p3403_p10 = pnand %p3402_p8, %p3398_p4 }
  0x1f   : > { %3406 = shalt.err (!%p3403_p10)
}
  0x20   : > { %s3490_s19 = smov 2048   ;;  %s3491_s24 = smov 1024  }
  0x21   : > { %s3492_s26 = smov 64   ;;  %p282_p1 = scmp.lt.s32.totalorder %s3488_s30, 3 }
  0x22   : > { %3106 = dma.hbm_to_vmem [thread:$0]  (!%p3604_p13), %s273_s25, 2048, %s275_s10, %s263_s13, %s3490_s19, %s3491_s24, %s3492_s26  }
  0x23   : > { %p283_p2 = pnand %p2865_p0, %p282_p1 }
  0x25   : > { %286 = sbr.rel (%p283_p2) target bundleno = 972 (0x3cc), region = 52 }
  0x2a   : > { %s3623_s20 = sand.u32 1, %s3480_s28  }
  0x2b   : > { %s2866_s29 = sshll.u32 %s3623_s20, 7  ;;  %s289_s14 = scalar_lea.sflag [#allocation3], %s3623_s20 }
  0x2c   : > { %s3627_s21 = scalar_lea.vmem [#allocation2], %s2866_s29 }
  0x2d   : > { %3467 = dma.done.wait (%p3582_p6), %s289_s14, 2048  }
  0x2e   : > { %3469 = vsyncadd (%p3582_p6), %s289_s14, 4294965248  ;;  %v336_v0 = vld [vmem:[%s3627_s21 + $0x40] sm:$0xff]  ;;  %v337_v1 = vld [vmem:[%s3627_s21 + $0x48] sm:$0xff]  ;;  %vm376_vm0 = vcmask 130048   ;;  %v3493_v41 = vmov 0   ;;  %vm1611_vm1 = vcmask 523264  }
  0x2f   : > { %v338_v2 = vld [vmem:[%s3627_s21 + $0x50] sm:$0xff]  ;;  %415 = vmatpush.msra.mxu0 %v336_v0  ;;  %456 = vmatpush.msra.mxu1 %v337_v1  ;;  %v339_v3 = vld [vmem:[%s3627_s21 + $0x58] sm:$0xff]  ;;  %v328_v4 = vld [vmem:[%s3627_s21] sm:$0xff]  ;;  %v360_v18 = vmul.f32 %v336_v0, %v336_v0  ;;  %v361_v19 = vmul.f32 %v337_v1, %v337_v1  ;;  %vm1874_vm2 = vcmask 1041409   ;;  %vm1876_vm3 = vcmask 1042434   ;;  %s2867_s16 = sshll.u32 %s3623_s20, 6 }
  0x30   : > { %v329_v5 = vld [vmem:[%s3627_s21 + $0x8] sm:$0xff]  ;;  %497 = vmatpush.msra.mxu2 %v338_v2  ;;  %538 = vmatpush.msra.mxu3 %v339_v3  ;;  %v330_v6 = vld [vmem:[%s3627_s21 + $0x10] sm:$0xff]  ;;  %v331_v7 = vld [vmem:[%s3627_s21 + $0x18] sm:$0xff]  ;;  %v362_v16 = vmul.f32 %v338_v2, %v338_v2  ;;  %v363_v17 = vmul.f32 %v339_v3, %v339_v3  ;;  %v352_v26 = vmul.f32 %v328_v4, %v328_v4  ;;  %vm1878_vm4 = vcmask 1043459   ;;  %s5286_s25 = scalar_lea.vmem [#allocation5], %s2867_s16  ;;  %s3098_s10 = sshll.u32 %s3560_s9, 6 }
  0x31   : > { %v3644_v8 = vld [vmem:[%s5339_s2] sm:$0xff]  ;;  %416 = vmatpush.msra.mxu0 %v328_v4  ;;  %457 = vmatpush.msra.mxu1 %v329_v5  ;;  %v3647_v9 = vld [vmem:[%s3627_s21 + $0x70] sm:$0xff]  ;;  %v3650_v10 = vld [vmem:[%s3627_s21 + $0x78] sm:$0xff]  ;;  %v354_v23 = vmul.f32 %v330_v6, %v330_v6  ;;  %v355_v24 = vmul.f32 %v331_v7, %v331_v7  ;;  %v353_v27 = vmul.f32 %v329_v5, %v329_v5  ;;  %vm1914_vm5 = vcmask 1043456   ;;  %s2784_s22 = scalar_lea.hbm %s5345_s8, %s3098_s10  ;;  %s2786_s15 = sshll.u32 %s5286_s25, 4  ;;  %s2787_s15 = int_to_ptr.vmem [resolvable:$true] %s2786_s15 }
  0x32   : > { %498 = vmatpush.msra.mxu2 %v330_v6  ;;  %539 = vmatpush.msra.mxu3 %v331_v7  ;;  %v3665_v11 = vld [vmem:[%s5339_s2 + $0x8] sm:$0xff]  ;;  %v3678_v12 = vld [vmem:[%s5339_s2 + $0x10] sm:$0xff]  ;;  %v340_v13 = vld [vmem:[%s3627_s21 + $0x60] sm:$0xff]  ;;  %v366_v32 = vmul.f32 %v3647_v9, %v3647_v9  ;;  %v367_v33 = vmul.f32 %v3650_v10, %v3650_v10  ;;  %vm1901_vm6 = vcmask 31744   ;;  %vm2576_vm7 = vcmask 261120   ;;  %s2788_s23 = sshll.u32 %s2784_s22, 4  ;;  %s2789_s23 = int_to_ptr.hbm [resolvable:$true] %s2788_s23 }
  0x33   : > { %2868 = vmatmul.msk.f32.vlgmr.msra.gmra.mxu0 %vm376_vm0, %v3644_v8  ;;  %2876 = vmatmul.msk.f32.vlgmr.msra.gmra.mxu1 %vm376_vm0, %v3644_v8  ;;  %v341_v14 = vld [vmem:[%s3627_s21 + $0x68] sm:$0xff]  ;;  %v3693_v15 = vld [vmem:[%s5339_s2 + $0x18] sm:$0xff]  ;;  %v334_v20 = vld [vmem:[%s3627_s21 + $0x30] sm:$0xff]  ;;  %v364_v34 = vmul.f32 %v340_v13, %v340_v13  ;;  %s2773_s9 = scalar_lea.sflag [#allocation4], %s3623_s20  ;;  %s3436_s19 = sshra.s32 %s2789_s23, 4  ;;  %s3437_s19 = int_to_ptr.hbm [resolvable:$true] %s3436_s19 }
  0x34   : > { %2884 = vmatmul.msk.f32.vlgmr.msra.gmra.mxu2 %vm376_vm0, %v3644_v8  ;;  %2892 = vmatmul.msk.f32.vlgmr.msra.gmra.mxu3 %vm376_vm0, %v3644_v8  ;;  %v335_v21 = vld [vmem:[%s3627_s21 + $0x38] sm:$0xff]  ;;  %v332_v22 = vld [vmem:[%s3627_s21 + $0x20] sm:$0xff]  ;;  %v333_v25 = vld [vmem:[%s3627_s21 + $0x28] sm:$0xff]  ;;  %v365_v35 = vmul.f32 %v341_v14, %v341_v14  ;;  %v358_v36 = vmul.f32 %v334_v20, %v334_v20  ;;  %s3438_s24 = scalar_lea.hbm %s3437_s19, 64  ;;  %s3442_s14 = scalar_lea.hbm %s5345_s8, 128 }
  0x35   : > { %661 = vmatpush.msrb.mxu2 %v3647_v9  ;;  %702 = vmatpush.msrb.mxu3 %v3650_v10  ;;  %v3710_v28 = vld [vmem:[%s5339_s2 + $0x20] sm:$0xff]  ;;  %v3723_v29 = vld [vmem:[%s5339_s2 + $0x28] sm:$0xff]  ;;  %v3736_v30 = vld [vmem:[%s5339_s2 + $0x30] sm:$0xff]  ;;  %v359_v37 = vmul.f32 %v335_v21, %v335_v21  ;;  %v356_v38 = vmul.f32 %v332_v22, %v332_v22  ;;  %v357_v39 = vmul.f32 %v333_v25, %v333_v25  ;;  %p3439_p6 = scmp.ne.s32.totalorder %s3437_s19, %s3438_s24  ;;  %p3443_p3 = scmp.lt.s32.totalorder %s3437_s19, %s5345_s8 }
  0x36   : > { %579 = vmatpush.msrb.mxu0 %v340_v13  ;;  %620 = vmatpush.msrb.mxu1 %v341_v14  ;;  %v3749_v31 = vld [vmem:[%s5339_s2 + $0x38] sm:$0xff]  ;;  %v1087_v40 = vld [vmem:[%s5340_s3 + $0x30] sm:$0xff]  ;;  %v1085_v43 = vld [vmem:[%s5340_s3 + $0x20] sm:$0xff]  ;;  %p3444_p4 = scmp.lt.s32.totalorder %s3442_s14, %s3438_s24 }
  0x37   : > { %662 = vmatpush.msrb.mxu2 %v334_v20  ;;  %703 = vmatpush.msrb.mxu3 %v335_v21  ;;  %v1088_v42 = vld [vmem:[%s5340_s3 + $0x38] sm:$0xff]  ;;  %v1086_v44 = vld [vmem:[%s5340_s3 + $0x28] sm:$0xff]  ;;  %v1081_v45 = vld [vmem:[%s5340_s3] sm:$0xff]  ;;  %p3440_p13 = pnand %p3439_p6, %p3589_p11 }
  0x38   : > { %580 = vmatpush.msrb.mxu0 %v332_v22  ;;  %621 = vmatpush.msrb.mxu1 %v333_v25  ;;  %v1082_v46 = vld [vmem:[%s5340_s3 + $0x8] sm:$0xff]  ;;  %v3852_v49 = vld [vmem:[%s5338_s1] sm:$0xff]  ;;  %v3894_v59 = vld [vmem:[%s5338_s1 + $0x10] sm:$0xff]  ;;  %p3445_p5 = por %p3444_p4, %p3443_p3 }
  0x39   : > { %849 = vmatpush.msra.mxu2 %v362_v16  ;;  %890 = vmatpush.msra.mxu3 %v363_v17  ;;  %v3873_v54 = vld [vmem:[%s5338_s1 + $0x8] sm:$0xff]  ;;  %v1083_v62 = vld [vmem:[%s5340_s3 + $0x10] sm:$0xff]  ;;  %v3918_v1 = vld [vmem:[%s5338_s1 + $0x18] sm:$0xff]  ;;  %p3441_p0 = pneg %p3440_p13 }
  0x3a   : > { %767 = vmatpush.msra.mxu0 %v360_v18  ;;  %808 = vmatpush.msra.mxu1 %v361_v19  ;;  %v1084_v4 = vld [vmem:[%s5340_s3 + $0x18] sm:$0xff]  ;;  %v3942_v7 = vld [vmem:[%s5338_s1 + $0x20] sm:$0xff]  ;;  %v3984_v17 = vld [vmem:[%s5338_s1 + $0x30] sm:$0xff] }
  0x3b   : > { %2869 = vmatmul.msk.f32.gmra.mxu0 %vm376_vm0, %v3665_v11  ;;  %2877 = vmatmul.msk.f32.gmra.mxu1 %vm376_vm0, %v3665_v11  ;;  %v4005_v22 = vld [vmem:[%s5338_s1 + $0x38] sm:$0xff]  ;;  %p3446_p7 = pnand %p3445_p5, %p3441_p0 }
  0x3c   : > { %2885 = vmatmul.msk.f32.gmra.mxu2 %vm376_vm0, %v3665_v11  ;;  %2893 = vmatmul.msk.f32.gmra.mxu3 %vm376_vm0, %v3665_v11 }
  0x3d   : > { %850 = vmatpush.msra.mxu2 %v354_v23  ;;  %891 = vmatpush.msra.mxu3 %v355_v24 }
  0x3e   : > { %768 = vmatpush.msra.mxu0 %v352_v26  ;;  %809 = vmatpush.msra.mxu1 %v353_v27 }
  0x3f   : > { %3149 = vset.pattern.permute.xlu0 %v3493_v41  ;;  %3150 = vset.pattern.permute.xlu1 %v3493_v41 }
  0x40   : > { %1121 = vperm.xlu0 %3149, %v1087_v40   ;;  %3151 = vset.pattern.permute.xlu2 %v3493_v41 }
  0x41   : > { %1111 = vperm.xlu1 %3150, %v1085_v43   ;;  %1101 = vperm.xlu2 %3151, %v1083_v62  }
  0x43   : > { %2870 = vmatmul.msk.f32.gmra.mxu0 %vm376_vm0, %v3678_v12  ;;  %2878 = vmatmul.msk.f32.gmra.mxu1 %vm376_vm0, %v3678_v12 }
  0x44   : > { %2886 = vmatmul.msk.f32.gmra.mxu2 %vm376_vm0, %v3678_v12  ;;  %2894 = vmatmul.msk.f32.gmra.mxu3 %vm376_vm0, %v3678_v12 }
  0x48   : > { %1126 = vperm.xlu0 %3149, %v1088_v42  }
  0x49   : > { %1116 = vperm.xlu1 %3150, %v1086_v44   ;;  %1106 = vperm.xlu2 %3151, %v1084_v4  }
  0x4b   : > { %2871 = vmatmul.msk.f32.gmra.mxu0 %vm376_vm0, %v3693_v15  ;;  %2879 = vmatmul.msk.f32.gmra.mxu1 %vm376_vm0, %v3693_v15 }
  0x4c   : > { %2887 = vmatmul.msk.f32.gmra.mxu2 %vm376_vm0, %v3693_v15  ;;  %2895 = vmatmul.msk.f32.gmra.mxu3 %vm376_vm0, %v3693_v15 }
  0x50   : > { %1091 = vperm.xlu0 %3149, %v1081_v45  }
  0x51   : > { %1096 = vperm.xlu1 %3150, %v1082_v46  }
  0x53   : > { %2872 = vmatmul.msk.f32.gmra.mxu0 %vm376_vm0, %v3710_v28  ;;  %2880 = vmatmul.msk.f32.gmra.mxu1 %vm376_vm0, %v3710_v28 }
  0x54   : > { %2888 = vmatmul.msk.f32.gmra.mxu2 %vm376_vm0, %v3710_v28  ;;  %2896 = vmatmul.msk.f32.gmra.mxu3 %vm376_vm0, %v3710_v28 }
  0x5b   : > { %2873 = vmatmul.msk.f32.gmra.mxu0 %vm376_vm0, %v3723_v29  ;;  %2881 = vmatmul.msk.f32.gmra.mxu1 %vm376_vm0, %v3723_v29 }
  0x5c   : > { %2889 = vmatmul.msk.f32.gmra.mxu2 %vm376_vm0, %v3723_v29  ;;  %2897 = vmatmul.msk.f32.gmra.mxu3 %vm376_vm0, %v3723_v29 }
  0x63   : > { %2874 = vmatmul.msk.f32.gmra.mxu0 %vm376_vm0, %v3736_v30  ;;  %2882 = vmatmul.msk.f32.gmra.mxu1 %vm376_vm0, %v3736_v30 }
  0x64   : > { %2890 = vmatmul.msk.f32.gmra.mxu2 %vm376_vm0, %v3736_v30  ;;  %2898 = vmatmul.msk.f32.gmra.mxu3 %vm376_vm0, %v3736_v30 }
  0x6b   : > { %2875 = vmatmul.msk.f32.gmra.mxu0 %vm376_vm0, %v3749_v31  ;;  %2883 = vmatmul.msk.f32.gmra.mxu1 %vm376_vm0, %v3749_v31 }
  0x6c   : > { %2891 = vmatmul.msk.f32.gmra.mxu2 %vm376_vm0, %v3749_v31  ;;  %2899 = vmatmul.msk.f32.gmra.mxu3 %vm376_vm0, %v3749_v31 }
  0x73   : > { %2900 = vmatmul.msk.f32.vlgmr.msrb.gmra.mxu0 %vm376_vm0, %v3644_v8  ;;  %2908 = vmatmul.msk.f32.vlgmr.msrb.gmra.mxu1 %vm376_vm0, %v3644_v8 }
  0x74   : > { %2916 = vmatmul.msk.f32.vlgmr.msrb.gmra.mxu2 %vm376_vm0, %v3644_v8  ;;  %2924 = vmatmul.msk.f32.vlgmr.msrb.gmra.mxu3 %vm376_vm0, %v3644_v8 }
  0x75   : > { %1013 = vmatpush.msrb.mxu2 %v366_v32  ;;  %1054 = vmatpush.msrb.mxu3 %v367_v33 }
  0x76   : > { %931 = vmatpush.msrb.mxu0 %v364_v34  ;;  %972 = vmatpush.msrb.mxu1 %v365_v35 }
  0x77   : > { %1014 = vmatpush.msrb.mxu2 %v358_v36  ;;  %1055 = vmatpush.msrb.mxu3 %v359_v37 }
  0x78   : > { %932 = vmatpush.msrb.mxu0 %v356_v38  ;;  %973 = vmatpush.msrb.mxu1 %v357_v39 }
  0x7b   : > { %2901 = vmatmul.msk.f32.gmra.mxu0 %vm376_vm0, %v3665_v11  ;;  %2909 = vmatmul.msk.f32.gmra.mxu1 %vm376_vm0, %v3665_v11 }
  0x7c   : > { %2917 = vmatmul.msk.f32.gmra.mxu2 %vm376_vm0, %v3665_v11  ;;  %2925 = vmatmul.msk.f32.gmra.mxu3 %vm376_vm0, %v3665_v11 }
  0x83   : > { %2902 = vmatmul.msk.f32.gmra.mxu0 %vm376_vm0, %v3678_v12  ;;  %2910 = vmatmul.msk.f32.gmra.mxu1 %vm376_vm0, %v3678_v12 }
  0x84   : > { %2918 = vmatmul.msk.f32.gmra.mxu2 %vm376_vm0, %v3678_v12  ;;  %2926 = vmatmul.msk.f32.gmra.mxu3 %vm376_vm0, %v3678_v12  ;;  %v3963_v12 = vld [vmem:[%s5338_s1 + $0x28] sm:$0xff] }
  0x8b   : > { %2903 = vmatmul.msk.f32.gmra.mxu0 %vm376_vm0, %v3693_v15  ;;  %2911 = vmatmul.msk.f32.gmra.mxu1 %vm376_vm0, %v3693_v15 }
  0x8c   : > { %2919 = vmatmul.msk.f32.gmra.mxu2 %vm376_vm0, %v3693_v15  ;;  %2927 = vmatmul.msk.f32.gmra.mxu3 %vm376_vm0, %v3693_v15 }
  0x93   : > { %2904 = vmatmul.msk.f32.gmra.mxu0 %vm376_vm0, %v3710_v28  ;;  %2912 = vmatmul.msk.f32.gmra.mxu1 %vm376_vm0, %v3710_v28 }
  0x94   : > { %2920 = vmatmul.msk.f32.gmra.mxu2 %vm376_vm0, %v3710_v28  ;;  %2928 = vmatmul.msk.f32.gmra.mxu3 %vm376_vm0, %v3710_v28 }
  0x9b   : > { %2905 = vmatmul.msk.f32.gmra.mxu0 %vm376_vm0, %v3723_v29  ;;  %2913 = vmatmul.msk.f32.gmra.mxu1 %vm376_vm0, %v3723_v29 }
  0x9c   : > { %2921 = vmatmul.msk.f32.gmra.mxu2 %vm376_vm0, %v3723_v29  ;;  %2929 = vmatmul.msk.f32.gmra.mxu3 %vm376_vm0, %v3723_v29 }
  0xa3   : > { %2906 = vmatmul.msk.f32.gmra.mxu0 %vm376_vm0, %v3736_v30  ;;  %2914 = vmatmul.msk.f32.gmra.mxu1 %vm376_vm0, %v3736_v30 }
  0xa4   : > { %2922 = vmatmul.msk.f32.gmra.mxu2 %vm376_vm0, %v3736_v30  ;;  %2930 = vmatmul.msk.f32.gmra.mxu3 %vm376_vm0, %v3736_v30 }
  0xab   : > { %2907 = vmatmul.msk.f32.gmra.mxu0 %vm376_vm0, %v3749_v31  ;;  %2915 = vmatmul.msk.f32.gmra.mxu1 %vm376_vm0, %v3749_v31 }
  0xac   : > { %2923 = vmatmul.msk.f32.gmra.mxu2 %vm376_vm0, %v3749_v31  ;;  %2931 = vmatmul.msk.f32.gmra.mxu3 %vm376_vm0, %v3749_v31 }
  0xb0   : > { %v3845_v47 = vpop.f32.mrf.mxu0  ;;  %v3847_v48 = vpop.f32.mrf.mxu1 }
  0xb3   : > { %2932 = vmatmul.msk.f32.vlgmr.msra.gmra.mxu0 %vm376_vm0, %v3852_v49  ;;  %2940 = vmatmul.msk.f32.vlgmr.msra.gmra.mxu1 %vm376_vm0, %v3852_v49 }
  0xb4   : > { %2948 = vmatmul.msk.f32.vlgmr.msra.gmra.mxu2 %vm376_vm0, %v3852_v49  ;;  %2956 = vmatmul.msk.f32.vlgmr.msra.gmra.mxu3 %vm376_vm0, %v3852_v49 }
  0xb7   : > { %v3862_v50 = vpop.f32.mrf.mxu2  ;;  %v3864_v51 = vpop.f32.mrf.mxu3 }
  0xb8   : > { %v3866_v52 = vpop.f32.mrf.mxu0  ;;  %v3868_v53 = vpop.f32.mrf.mxu1 }
  0xbb   : > { %2933 = vmatmul.msk.f32.gmra.mxu0 %vm376_vm0, %v3873_v54  ;;  %2941 = vmatmul.msk.f32.gmra.mxu1 %vm376_vm0, %v3873_v54 }
  0xbc   : > { %2949 = vmatmul.msk.f32.gmra.mxu2 %vm376_vm0, %v3873_v54  ;;  %2957 = vmatmul.msk.f32.gmra.mxu3 %vm376_vm0, %v3873_v54 }
  0xbf   : > { %v3883_v55 = vpop.f32.mrf.mxu2  ;;  %v3885_v56 = vpop.f32.mrf.mxu3 }
  0xc0   : > { %v3887_v57 = vpop.f32.mrf.mxu0  ;;  %v3889_v58 = vpop.f32.mrf.mxu1 }
  0xc3   : > { %2934 = vmatmul.msk.f32.gmra.mxu0 %vm376_vm0, %v3894_v59  ;;  %2942 = vmatmul.msk.f32.gmra.mxu1 %vm376_vm0, %v3894_v59 }
  0xc4   : > { %2950 = vmatmul.msk.f32.gmra.mxu2 %vm376_vm0, %v3894_v59  ;;  %2958 = vmatmul.msk.f32.gmra.mxu3 %vm376_vm0, %v3894_v59 }
  0xc7   : > { %v3904_v60 = vpop.f32.mrf.mxu2  ;;  %v3906_v61 = vpop.f32.mrf.mxu3 }
  0xc8   : > { %v3911_v63 = vpop.f32.mrf.mxu0  ;;  %v3913_v0 = vpop.f32.mrf.mxu1 }
  0xcb   : > { %2935 = vmatmul.msk.f32.gmra.mxu0 %vm376_vm0, %v3918_v1  ;;  %2943 = vmatmul.msk.f32.gmra.mxu1 %vm376_vm0, %v3918_v1 }
  0xcc   : > { %2951 = vmatmul.msk.f32.gmra.mxu2 %vm376_vm0, %v3918_v1  ;;  %2959 = vmatmul.msk.f32.gmra.mxu3 %vm376_vm0, %v3918_v1 }
  0xcf   : > { %v3928_v2 = vpop.f32.mrf.mxu2  ;;  %v3930_v3 = vpop.f32.mrf.mxu3 }
  0xd0   : > { %v3935_v5 = vpop.f32.mrf.mxu0  ;;  %v3937_v6 = vpop.f32.mrf.mxu1 }
  0xd3   : > { %2936 = vmatmul.msk.f32.gmra.mxu0 %vm376_vm0, %v3942_v7  ;;  %2944 = vmatmul.msk.f32.gmra.mxu1 %vm376_vm0, %v3942_v7 }
  0xd4   : > { %2952 = vmatmul.msk.f32.gmra.mxu2 %vm376_vm0, %v3942_v7  ;;  %2960 = vmatmul.msk.f32.gmra.mxu3 %vm376_vm0, %v3942_v7 }
  0xd7   : > { %v3952_v8 = vpop.f32.mrf.mxu2  ;;  %v3954_v9 = vpop.f32.mrf.mxu3 }
  0xd8   : > { %v3956_v10 = vpop.f32.mrf.mxu0  ;;  %v3958_v11 = vpop.f32.mrf.mxu1 }
  0xdb   : > { %2937 = vmatmul.msk.f32.gmra.mxu0 %vm376_vm0, %v3963_v12  ;;  %2945 = vmatmul.msk.f32.gmra.mxu1 %vm376_vm0, %v3963_v12 }
  0xdc   : > { %2953 = vmatmul.msk.f32.gmra.mxu2 %vm376_vm0, %v3963_v12  ;;  %2961 = vmatmul.msk.f32.gmra.mxu3 %vm376_vm0, %v3963_v12 }
  0xdf   : > { %v3973_v13 = vpop.f32.mrf.mxu2  ;;  %v3975_v14 = vpop.f32.mrf.mxu3 }
  0xe0   : > { %v3977_v15 = vpop.f32.mrf.mxu0  ;;  %v3979_v16 = vpop.f32.mrf.mxu1 }
  0xe3   : > { %2938 = vmatmul.msk.f32.gmra.mxu0 %vm376_vm0, %v3984_v17  ;;  %2946 = vmatmul.msk.f32.gmra.mxu1 %vm376_vm0, %v3984_v17 }
  0xe4   : > { %2954 = vmatmul.msk.f32.gmra.mxu2 %vm376_vm0, %v3984_v17  ;;  %2962 = vmatmul.msk.f32.gmra.mxu3 %vm376_vm0, %v3984_v17 }
  0xe7   : > { %v3994_v18 = vpop.f32.mrf.mxu2  ;;  %v3996_v19 = vpop.f32.mrf.mxu3 }
  0xe8   : > { %v3998_v20 = vpop.f32.mrf.mxu0  ;;  %v4000_v21 = vpop.f32.mrf.mxu1 }
  0xeb   : > { %2939 = vmatmul.msk.f32.gmra.mxu0 %vm376_vm0, %v4005_v22  ;;  %2947 = vmatmul.msk.f32.gmra.mxu1 %vm376_vm0, %v4005_v22 }
  0xec   : > { %2955 = vmatmul.msk.f32.gmra.mxu2 %vm376_vm0, %v4005_v22  ;;  %2963 = vmatmul.msk.f32.gmra.mxu3 %vm376_vm0, %v4005_v22 }
  0xef   : > { %v4015_v23 = vpop.f32.mrf.mxu2  ;;  %v4017_v24 = vpop.f32.mrf.mxu3 }
  0xf0   : > { %v4019_v25 = vpop.f32.mrf.mxu0  ;;  %v4021_v26 = vpop.f32.mrf.mxu1 }
  0xf1   : > { %5390 = vst [vmem:[#allocation10_spill] sm:$0xff] %v4019_v25 }
  0xf2   : > { %5391 = vst [vmem:[#allocation11_spill] sm:$0xff] %v4021_v26 }
  0xf3   : > { %2964 = vmatmul.msk.f32.vlgmr.msrb.gmra.mxu0 %vm376_vm0, %v3852_v49  ;;  %2972 = vmatmul.msk.f32.vlgmr.msrb.gmra.mxu1 %vm376_vm0, %v3852_v49 }
  0xf4   : > { %2980 = vmatmul.msk.f32.vlgmr.msrb.gmra.mxu2 %vm376_vm0, %v3852_v49  ;;  %2988 = vmatmul.msk.f32.vlgmr.msrb.gmra.mxu3 %vm376_vm0, %v3852_v49 }
  0xf7   : > { %v4031_v27 = vpop.f32.mrf.mxu2  ;;  %v4033_v28 = vpop.f32.mrf.mxu3 }
  0xf8   : > { %5392 = vst [vmem:[#allocation12_spill] sm:$0xff] %v4031_v27  ;;  %v4035_v29 = vpop.f32.mrf.mxu0  ;;  %v4037_v30 = vpop.f32.mrf.mxu1 }
  0xf9   : > { %5393 = vst [vmem:[#allocation13_spill] sm:$0xff] %v4033_v28 }
  0xfa   : > { %5394 = vst [vmem:[#allocation14_spill] sm:$0xff] %v4035_v29 }
  0xfb   : > { %5395 = vst [vmem:[#allocation15_spill] sm:$0xff] %v4037_v30  ;;  %2965 = vmatmul.msk.f32.gmra.mxu0 %vm376_vm0, %v3873_v54  ;;  %2973 = vmatmul.msk.f32.gmra.mxu1 %vm376_vm0, %v3873_v54 }
  0xfc   : > { %2981 = vmatmul.msk.f32.gmra.mxu2 %vm376_vm0, %v3873_v54  ;;  %2989 = vmatmul.msk.f32.gmra.mxu3 %vm376_vm0, %v3873_v54 }
  0xff   : > { %v4047_v31 = vpop.f32.mrf.mxu2  ;;  %v4049_v32 = vpop.f32.mrf.mxu3 }
 0x100   : > { %5396 = vst [vmem:[#allocation16_spill] sm:$0xff] %v4047_v31  ;;  %v4051_v33 = vpop.f32.mrf.mxu0  ;;  %v4053_v34 = vpop.f32.mrf.mxu1 }
 0x101   : > { %5397 = vst [vmem:[#allocation17_spill] sm:$0xff] %v4049_v32  ;;  %v4164_v32 = vpop.permute.xlu2 %1101 }
 0x102   : > { %5398 = vst [vmem:[#allocation18_spill] sm:$0xff] %v4051_v33 }
 0x103   : > { %5399 = vst [vmem:[#allocation19_spill] sm:$0xff] %v4053_v34  ;;  %2966 = vmatmul.msk.f32.gmra.mxu0 %vm376_vm0, %v3894_v59  ;;  %2974 = vmatmul.msk.f32.gmra.mxu1 %vm376_vm0, %v3894_v59 }
 0x104   : > { %2982 = vmatmul.msk.f32.gmra.mxu2 %vm376_vm0, %v3894_v59  ;;  %2990 = vmatmul.msk.f32.gmra.mxu3 %vm376_vm0, %v3894_v59 }
 0x107   : > { %v4063_v35 = vpop.f32.mrf.mxu2  ;;  %v4065_v36 = vpop.f32.mrf.mxu3 }
 0x108   : > { %5400 = vst [vmem:[#allocation20_spill] sm:$0xff] %v4063_v35  ;;  %v4067_v37 = vpop.f32.mrf.mxu0  ;;  %v4069_v38 = vpop.f32.mrf.mxu1 }
 0x109   : > { %5401 = vst [vmem:[#allocation21_spill] sm:$0xff] %v4065_v36 }
 0x10a   : > { %5402 = vst [vmem:[#allocation22_spill] sm:$0xff] %v4067_v37 }
 0x10b   : > { %5403 = vst [vmem:[#allocation23_spill] sm:$0xff] %v4069_v38  ;;  %2967 = vmatmul.msk.f32.gmra.mxu0 %vm376_vm0, %v3918_v1  ;;  %2975 = vmatmul.msk.f32.gmra.mxu1 %vm376_vm0, %v3918_v1 }
 0x10c   : > { %2983 = vmatmul.msk.f32.gmra.mxu2 %vm376_vm0, %v3918_v1  ;;  %2991 = vmatmul.msk.f32.gmra.mxu3 %vm376_vm0, %v3918_v1 }
 0x10f   : > { %v4079_v39 = vpop.f32.mrf.mxu2  ;;  %v4081_v40 = vpop.f32.mrf.mxu3 }
 0x110   : > { %5404 = vst [vmem:[#allocation24_spill] sm:$0xff] %v4079_v39  ;;  %v4083_v41 = vpop.f32.mrf.mxu0  ;;  %v4085_v42 = vpop.f32.mrf.mxu1 }
 0x111   : > { %5405 = vst [vmem:[#allocation25_spill] sm:$0xff] %v4081_v40 }
 0x112   : > { %5406 = vst [vmem:[#allocation26_spill] sm:$0xff] %v4083_v41 }
 0x113   : > { %5407 = vst [vmem:[#allocation27_spill] sm:$0xff] %v4085_v42  ;;  %2968 = vmatmul.msk.f32.gmra.mxu0 %vm376_vm0, %v3942_v7  ;;  %2976 = vmatmul.msk.f32.gmra.mxu1 %vm376_vm0, %v3942_v7 }
 0x114   : > { %2984 = vmatmul.msk.f32.gmra.mxu2 %vm376_vm0, %v3942_v7  ;;  %2992 = vmatmul.msk.f32.gmra.mxu3 %vm376_vm0, %v3942_v7 }
 0x117   : > { %v4095_v43 = vpop.f32.mrf.mxu2  ;;  %v4097_v44 = vpop.f32.mrf.mxu3 }
 0x118   : > { %5408 = vst [vmem:[#allocation28_spill] sm:$0xff] %v4095_v43  ;;  %v4099_v45 = vpop.f32.mrf.mxu0  ;;  %v4101_v46 = vpop.f32.mrf.mxu1 }
 0x119   : > { %5409 = vst [vmem:[#allocation29_spill] sm:$0xff] %v4097_v44 }
 0x11a   : > { %5410 = vst [vmem:[#allocation30_spill] sm:$0xff] %v4099_v45 }
 0x11b   : > { %5411 = vst [vmem:[#allocation31_spill] sm:$0xff] %v4101_v46  ;;  %2969 = vmatmul.msk.f32.gmra.mxu0 %vm376_vm0, %v3963_v12  ;;  %2977 = vmatmul.msk.f32.gmra.mxu1 %vm376_vm0, %v3963_v12 }
 0x11c   : > { %2985 = vmatmul.msk.f32.gmra.mxu2 %vm376_vm0, %v3963_v12  ;;  %2993 = vmatmul.msk.f32.gmra.mxu3 %vm376_vm0, %v3963_v12 }
 0x11f   : > { %v4111_v49 = vpop.f32.mrf.mxu2  ;;  %v4113_v54 = vpop.f32.mrf.mxu3 }
 0x120   : > { %5412 = vst [vmem:[#allocation32_spill] sm:$0xff] %v4111_v49  ;;  %v4115_v59 = vpop.f32.mrf.mxu0  ;;  %v4117_v62 = vpop.f32.mrf.mxu1 }
 0x121   : > { %5413 = vst [vmem:[#allocation33_spill] sm:$0xff] %v4113_v54 }
 0x122   : > { %5414 = vst [vmem:[#allocation34_spill] sm:$0xff] %v4115_v59 }
 0x123   : > { %5415 = vst [vmem:[#allocation35_spill] sm:$0xff] %v4117_v62  ;;  %2970 = vmatmul.msk.f32.gmra.mxu0 %vm376_vm0, %v3984_v17  ;;  %2978 = vmatmul.msk.f32.gmra.mxu1 %vm376_vm0, %v3984_v17  ;;  %v4139_v62 = vpop.permute.xlu1 %1111 }
 0x124   : > { %2986 = vmatmul.msk.f32.gmra.mxu2 %vm376_vm0, %v3984_v17  ;;  %2994 = vmatmul.msk.f32.gmra.mxu3 %vm376_vm0, %v3984_v17  ;;  %5420 = vst [vmem:[#allocation40_spill] sm:$0xff] %v4139_v62  ;;  %v4145_v17 = vpop.permute.xlu0 %1121 }
 0x125   : > { %5421 = vst [vmem:[#allocation41_spill] sm:$0xff] %v4145_v17 }
 0x127   : > { %v4127_v1 = vpop.f32.mrf.mxu2  ;;  %v4129_v4 = vpop.f32.mrf.mxu3 }
 0x128   : > { %5416 = vst [vmem:[#allocation36_spill] sm:$0xff] %v4127_v1  ;;  %v4131_v7 = vpop.f32.mrf.mxu0  ;;  %v4133_v12 = vpop.f32.mrf.mxu1 }
 0x129   : > { %5417 = vst [vmem:[#allocation37_spill] sm:$0xff] %v4129_v4 }
 0x12a   : > { %5418 = vst [vmem:[#allocation38_spill] sm:$0xff] %v4131_v7 }
 0x12b   : > { %5419 = vst [vmem:[#allocation39_spill] sm:$0xff] %v4133_v12  ;;  %2971 = vmatmul.msk.f32.gmra.mxu0 %vm376_vm0, %v4005_v22  ;;  %2979 = vmatmul.msk.f32.gmra.mxu1 %vm376_vm0, %v4005_v22  ;;  %v4151_v59 = vpop.permute.xlu1 %1116 }
 0x12c   : > { %2987 = vmatmul.msk.f32.gmra.mxu2 %vm376_vm0, %v4005_v22  ;;  %2995 = vmatmul.msk.f32.gmra.mxu3 %vm376_vm0, %v4005_v22  ;;  %5424 = vst [vmem:[#allocation44_spill] sm:$0xff] %v4151_v59  ;;  %v4153_v44 = vpop.permute.xlu0 %1126 }
 0x12d   : > { %5425 = vst [vmem:[#allocation45_spill] sm:$0xff] %v4153_v44 }
 0x12f   : > { %v4147_v4 = vpop.f32.mrf.mxu2  ;;  %v4149_v7 = vpop.f32.mrf.mxu3 }
 0x130   : > { %5422 = vst [vmem:[#allocation42_spill] sm:$0xff] %v4147_v4  ;;  %v770_v12 = vpop.f32.mrf.mxu0  ;;  %v811_v1 = vpop.f32.mrf.mxu1 }
 0x131   : > { %5423 = vst [vmem:[#allocation43_spill] sm:$0xff] %v4149_v7  ;;  %v771_v34 = vadd.f32 %v770_v12, %v3845_v47 }
 0x133   : > { %v4158_v40 = vpop.permute.xlu1 %1096 }
 0x134   : > { %5426 = vst [vmem:[#allocation46_spill] sm:$0xff] %v4158_v40  ;;  %v4166_v39 = vpop.permute.xlu0 %1091 }
 0x135   : > { %5427 = vst [vmem:[#allocation47_spill] sm:$0xff] %v4166_v39 }
 0x137   : > { %v852_v54 = vpop.f32.mrf.mxu2  ;;  %v893_v49 = vpop.f32.mrf.mxu3 }
 0x138   : > { %v773_v46 = vpop.f32.mrf.mxu0  ;;  %v814_v45 = vpop.f32.mrf.mxu1  ;;  %v853_v22 = vadd.f32 %v852_v54, %v3862_v50  ;;  %v894_v28 = vadd.f32 %v893_v49, %v3864_v51 }
 0x139   : > { %v774_v31 = vadd.f32 %v773_v46, %v3866_v52  ;;  %v815_v33 = vadd.f32 %v814_v45, %v3868_v53  ;;  %v812_v52 = vadd.f32 %v811_v1, %v3847_v48 }
 0x13a   : > { %v4169_v27 = vadd.f32 %v4166_v39, %v853_v22 }
 0x13b   : > { %v4207_v45 = vadd.f32 %v4158_v40, %v815_v33 }
 0x13d   : > { %5431 = vst [vmem:[#allocation51_spill] sm:$0xff] %v4207_v45 }
 0x13f   : > { %v855_v43 = vpop.f32.mrf.mxu2  ;;  %v896_v42 = vpop.f32.mrf.mxu3 }
 0x140   : > { %v856_v41 = vadd.f32 %v855_v43, %v3883_v55  ;;  %v897_v4 = vadd.f32 %v896_v42, %v3885_v56  ;;  %v776_v36 = vpop.f32.mrf.mxu0  ;;  %v817_v7 = vpop.f32.mrf.mxu1  ;;  %v4175_v55 = vadd.f32 %v4166_v39, %v894_v28 }
 0x141   : > { %v4184_v28 = vpop.permute.xlu2 %1106  ;;  %v777_v37 = vadd.f32 %v776_v36, %v3887_v57  ;;  %v818_v25 = vadd.f32 %v817_v7, %v3889_v58  ;;  %v4204_v58 = vadd.f32 %v4166_v39, %v771_v34 }
 0x142   : > { %v4162_v35 = vadd.f32 %v4158_v40, %v856_v41  ;;  %v4172_v50 = vadd.f32 %v4158_v40, %v897_v4 }
 0x143   : > { %v4201_v53 = vadd.f32 %v4164_v32, %v777_v37  ;;  %5430 = vst [vmem:[#allocation50_spill] sm:$0xff] %v4204_v58  ;;  %v4210_v48 = vadd.f32 %v4164_v32, %v818_v25 }
 0x144   : > { %v1207_v56 = vmax.f32 %v4169_v27, %v4162_v35  ;;  %v1214_v41 = vmax.f32 %v4175_v55, %v4172_v50 }
 0x145   : > { %5429 = vst [vmem:[#allocation49_spill] sm:$0xff] %v4201_v53 }
 0x146   : > { %v1208_v54 = vrot.slane %v1207_v56, 4  ;;  %v1215_v4 = vrot.slane %v1214_v41, 4  ;;  %5432 = vst [vmem:[#allocation52_spill] sm:$0xff] %v4210_v48 }
 0x147   : > { %v858_v51 = vpop.f32.mrf.mxu2  ;;  %v899_v42 = vpop.f32.mrf.mxu3 }
 0x148   : > { %v779_v43 = vpop.f32.mrf.mxu0  ;;  %v820_v49 = vpop.f32.mrf.mxu1  ;;  %v1209_v26 = vmax.f32 %v1207_v56, %v1208_v54  ;;  %v1216_v46 = vmax.f32 %v1214_v41, %v1215_v4 }
 0x149   : > { %v780_v22 = vadd.f32 %v779_v43, %v3911_v63  ;;  %v821_v38 = vadd.f32 %v820_v49, %v3913_v0  ;;  %v4195_v0 = vadd.f32 %v4158_v40, %v774_v31 }
 0x14a   : > { %v1210_v7 = vrot.slane %v1209_v26, 2  ;;  %v1217_v1 = vrot.slane %v1216_v46, 2 }
 0x14b   : > { %v4191_v30 = vadd.f32 %v4184_v28, %v780_v22  ;;  %5428 = vst [vmem:[#allocation48_spill] sm:$0xff] %v4195_v0  ;;  %v4198_v57 = vadd.f32 %v4184_v28, %v821_v38  ;;  %v4215_v38 = vadd.f32 %v4166_v39, %v812_v52  ;;  %v1193_v37 = vmax.f32 %v4204_v58, %v4195_v0 }
 0x14c   : > { %v1211_v12 = vmax.f32 %v1209_v26, %v1210_v7  ;;  %v1218_v54 = vmax.f32 %v1216_v46, %v1217_v1  ;;  %v900_v46 = vadd.f32 %v899_v42, %v3906_v61 }
 0x14d   : > { %v1249_v31 = vmax.f32 %v4201_v53, %v4191_v30  ;;  %5433 = vst [vmem:[#allocation53_spill] sm:$0xff] %v4215_v38  ;;  %v1256_v34 = vmax.f32 %v4210_v48, %v4198_v57  ;;  %v1200_v33 = vmax.f32 %v4215_v38, %v4207_v45  ;;  %v1194_v49 = vrot.slane %v1193_v37, 4 }
 0x14e   : > { %v1212_v0 = vrot.slane %v1211_v12, 1  ;;  %v1219_v38 = vrot.slane %v1218_v54, 1  ;;  %v859_v53 = vadd.f32 %v858_v51, %v3904_v60 }
 0x14f   : > { %v861_v63 = vpop.f32.mrf.mxu2  ;;  %v902_v43 = vpop.f32.mrf.mxu3  ;;  %v1250_v56 = vrot.slane %v1249_v31, 4  ;;  %v1257_v22 = vrot.slane %v1256_v34, 4  ;;  %v1201_v58 = vrot.slane %v1200_v33, 4  ;;  %v1195_v7 = vmax.f32 %v1193_v37, %v1194_v49 }
 0x150   : > { %v782_v47 = vpop.f32.mrf.mxu0  ;;  %v823_v36 = vpop.f32.mrf.mxu1  ;;  %v862_v48 = vadd.f32 %v861_v63, %v3928_v2  ;;  %v903_v29 = vadd.f32 %v902_v43, %v3930_v3  ;;  %v4247_v42 = vmax.f32 %v1218_v54, %v1219_v38 }
 0x151   : > { %v1251_v40 = vmax.f32 %v1249_v31, %v1250_v56  ;;  %v783_v26 = vadd.f32 %v782_v47, %v3935_v5  ;;  %v1258_v45 = vmax.f32 %v1256_v34, %v1257_v22  ;;  %v4235_v31 = vmax.f32 %v1211_v12, %v1212_v0 }
 0x152   : > { %v824_v2 = vadd.f32 %v823_v36, %v3937_v6  ;;  %v4239_v5 = vadd.f32 %v4184_v28, %v862_v48  ;;  %v4242_v63 = vadd.f32 %v4184_v28, %v903_v29  ;;  %v1196_v51 = vrot.slane %v1195_v7, 2  ;;  %5435 = vst [vmem:[#allocation55_spill] sm:$0xff] %v4247_v42 }
 0x153   : > { %5434 = vst [vmem:[#allocation54_spill] sm:$0xff] %v4235_v31  ;;  %v1252_v3 = vrot.slane %v1251_v40, 2  ;;  %v4245_v60 = vadd.f32 %v4139_v62, %v783_v26  ;;  %v4251_v47 = vadd.f32 %v4164_v32, %v859_v53  ;;  %v4254_v36 = vadd.f32 %v4164_v32, %v900_v46 }
 0x154   : > { %v1419_v38 = vsub.f32 %v4169_v27, %v4235_v31  ;;  %v4271_v12 = vadd.f32 %v4139_v62, %v824_v2  ;;  %v1428_v56 = vsub.f32 %v4172_v50, %v4247_v42 }
 0x155   : > { %v1253_v53 = vmax.f32 %v1251_v40, %v1252_v3  ;;  %v1263_v34 = vmax.f32 %v4251_v47, %v4239_v5 }
 0x156   : > { %v4286_v22 = vmul.f32 1.442695, %v1419_v38 }
 0x157   : > { %v864_v25 = vpop.f32.mrf.mxu2  ;;  %v4223_v41 = vpop.f32.mrf.mxu3  ;;  %v1264_v26 = vrot.slane %v1263_v34, 4  ;;  %v1254_v2 = vrot.slane %v1253_v53, 1 }
 0x158   : > { %v785_v4 = vpop.f32.mrf.mxu0  ;;  %v826_v52 = vpop.f32.mrf.mxu1  ;;  %v865_v37 = vadd.f32 %v864_v25, %v3952_v8  ;;  %v1420_v8 = vsub.f32 %v4175_v55, %v4247_v42  ;;  %5436 = vst [vmem:[#allocation56_spill] sm:$0xff] %v4286_v22  ;;  %v1503_v55 = vmul.f32 1.442695, %v1428_v56  ;;  %v906_v3 = vadd.f32 %v4223_v41, %v3954_v9 }
 0x159   : > { %v786_v39 = vadd.f32 %v785_v4, %v3956_v10  ;;  %v827_v10 = vadd.f32 %v826_v52, %v3958_v11  ;;  %v1202_v4 = vmax.f32 %v1200_v33, %v1201_v58  ;;  %v1259_v11 = vrot.slane %v1258_v45, 2 }
 0x15a   : > { %v1270_v33 = vmax.f32 %v4254_v36, %v4242_v63  ;;  %v4289_v52 = vadd.f32 %v4139_v62, %v865_v37  ;;  %v1265_v41 = vmax.f32 %v1263_v34, %v1264_v26  ;;  %v4305_v42 = vmax.f32 %v1253_v53, %v1254_v2 }
 0x15b   : > { %v4232_v1 = vadd.f32 %v4151_v59, %v786_v39  ;;  %v4259_v58 = vadd.f32 %v4151_v59, %v827_v10  ;;  %v1203_v48 = vrot.slane %v1202_v4, 2  ;;  %v1260_v49 = vmax.f32 %v1258_v45, %v1259_v11 }
 0x15c   : > { %5438 = vst [vmem:[#allocation58_spill] sm:$0xff] %v4305_v42  ;;  %v1441_v26 = vsub.f32 %v4191_v30, %v4305_v42 }
 0x15d   : > { %v1305_v29 = vmax.f32 %v4245_v60, %v4232_v1  ;;  %v1312_v25 = vmax.f32 %v4271_v12, %v4259_v58  ;;  %v4284_v54 = vmax.f32 %v1202_v4, %v1203_v48  ;;  %v1261_v11 = vrot.slane %v1260_v49, 1 }
 0x15f   : > { %v867_v61 = vpop.f32.mrf.mxu2  ;;  %v908_v39 = vpop.f32.mrf.mxu3  ;;  %v1306_v40 = vrot.slane %v1305_v29, 4 }
 0x160   : > { %v868_v43 = vadd.f32 %v867_v61, %v3973_v13  ;;  %v788_v0 = vpop.f32.mrf.mxu0  ;;  %v829_v6 = vpop.f32.mrf.mxu1  ;;  %v1427_v13 = vsub.f32 %v4162_v35, %v4235_v31  ;;  %v4278_v35 = vmax.f32 %v1195_v7, %v1196_v51  ;;  %v909_v50 = vadd.f32 %v908_v39, %v3975_v14 }
 0x161   : > { %v1271_v7 = vrot.slane %v1270_v33, 4  ;;  %v1307_v48 = vmax.f32 %v1305_v29, %v1306_v40  ;;  %v1313_v14 = vrot.slane %v1312_v25, 4  ;;  %v789_v39 = vadd.f32 %v788_v0, %v3977_v15 }
 0x162   : > { %v4276_v27 = vadd.f32 %v4151_v59, %v868_v43  ;;  %v1501_v45 = vmul.f32 1.442695, %v1427_v13  ;;  %v4296_v43 = vmul.f32 1.442695, %v1420_v8  ;;  %v4300_v38 = vadd.f32 %v4151_v59, %v909_v50 }
 0x163   : > { %v830_v13 = vadd.f32 %v829_v6, %v3979_v16  ;;  %v1272_v56 = vmax.f32 %v1270_v33, %v1271_v7  ;;  %v4308_v29 = vadd.f32 %v4139_v62, %v906_v3  ;;  %v4310_v15 = vmax.f32 %v1260_v49, %v1261_v11 }
 0x164   : > { %v1319_v4 = vmax.f32 %v4289_v52, %v4276_v27  ;;  %5437 = vst [vmem:[#allocation57_spill] sm:$0xff] %v4296_v43  ;;  %3152 = vpow2.f32 %v1501_v45  ;;  %v1308_v0 = vrot.slane %v1307_v48, 2  ;;  %v1314_v40 = vmax.f32 %v1312_v25, %v1313_v14 }
 0x165   : > { %3154 = vpow2.f32 %v1503_v55  ;;  %5439 = vst [vmem:[#allocation59_spill] sm:$0xff] %v4310_v15  ;;  %v4313_v16 = vadd.f32 %v4145_v17, %v789_v39  ;;  %v4321_v6 = vadd.f32 %v4145_v17, %v830_v13  ;;  %v1266_v33 = vrot.slane %v1265_v41, 2 }
 0x166   : > { %v1320_v8 = vrot.slane %v1319_v4, 4  ;;  %v1273_v49 = vrot.slane %v1272_v56, 2  ;;  %v1442_v3 = vsub.f32 %v4198_v57, %v4310_v15  ;;  %v1309_v14 = vmax.f32 %v1307_v48, %v1308_v0 }
 0x167   : > { %v870_v46 = vpop.f32.mrf.mxu2  ;;  %v911_v10 = vpop.f32.mrf.mxu3  ;;  %v1315_v39 = vrot.slane %v1314_v40, 2 }
 0x168   : > { %v791_v61 = vpop.f32.mrf.mxu0  ;;  %v832_v51 = vpop.f32.mrf.mxu1  ;;  %v871_v53 = vadd.f32 %v870_v46, %v3994_v18  ;;  %v1321_v7 = vmax.f32 %v1319_v4, %v1320_v8  ;;  %v912_v2 = vadd.f32 %v911_v10, %v3996_v19  ;;  %v5441_v4 = vld [vmem:[#allocation49_spill] sm:$0xff]  ;;  %v1274_v48 = vmax.f32 %v1272_v56, %v1273_v49 }
 0x169   : > { %v792_v37 = vadd.f32 %v791_v61, %v3998_v20  ;;  %v833_v9 = vadd.f32 %v832_v51, %v4000_v21  ;;  %v1326_v21 = vmax.f32 %v4308_v29, %v4300_v38  ;;  %v1433_v19 = vsub.f32 %v5441_v4, %v4305_v42 }
 0x16a   : > { %v4340_v61 = vpop.eup %3152  ;;  %v1529_v4 = vmul.f32 1.442695, %v1441_v26  ;;  %v1531_v42 = vmul.f32 1.442695, %v1442_v3  ;;  %v1275_v3 = vrot.slane %v1274_v48, 1 }
 0x16b   : > { %v4316_v20 = vadd.f32 %v4153_v44, %v792_v37  ;;  %v4325_v34 = vadd.f32 %v4153_v44, %v833_v9  ;;  %5440 = vst [vmem:[#allocation60_spill] sm:$0xff] %v4340_v61  ;;  %v4346_v10 = vpop.eup %3154  ;;  %v1327_v13 = vrot.slane %v1326_v21, 4  ;;  %v4349_v37 = vadd.f32 %v4145_v17, %v871_v53 }
 0x16c   : > { %5442 = vst [vmem:[#allocation49_spill] sm:$0xff] %v4346_v10  ;;  %3156 = vpow2.f32 %v1529_v4 }
 0x16d   : > { %v1361_v25 = vmax.f32 %v4313_v16, %v4316_v20  ;;  %v1368_v55 = vmax.f32 %v4321_v6, %v4325_v34  ;;  %3158 = vpow2.f32 %v1531_v42 }
 0x16f   : > { %v873_v50 = vpop.f32.mrf.mxu2  ;;  %v914_v45 = vpop.f32.mrf.mxu3  ;;  %v1362_v51 = vrot.slane %v1361_v25, 4  ;;  %v1369_v57 = vrot.slane %v1368_v55, 4 }
 0x170   : > { %v4334_v18 = vpop.f32.mrf.mxu0  ;;  %v4336_v46 = vpop.f32.mrf.mxu1  ;;  %v874_v11 = vadd.f32 %v873_v50, %v4015_v23  ;;  %v915_v30 = vadd.f32 %v914_v45, %v4017_v24  ;;  %v1267_v24 = vmax.f32 %v1265_v41, %v1266_v33  ;;  %v1322_v50 = vrot.slane %v1321_v7, 2 }
 0x171   : > { %v1363_v9 = vmax.f32 %v1361_v25, %v1362_v51  ;;  %v4358_v45 = vadd.f32 %v4145_v17, %v912_v2  ;;  %v1370_v31 = vmax.f32 %v1368_v55, %v1369_v57  ;;  %v1310_v25 = vrot.slane %v1309_v14, 1 }
 0x172   : > { %v4352_v8 = vadd.f32 %v4153_v44, %v874_v11  ;;  %v4355_v23 = vadd.f32 %v4153_v44, %v915_v30  ;;  %v1316_v51 = vmax.f32 %v1314_v40, %v1315_v39  ;;  %v1328_v30 = vmax.f32 %v1326_v21, %v1327_v13 }
 0x173   : > { %v1364_v0 = vrot.slane %v1363_v9, 2  ;;  %v1371_v41 = vrot.slane %v1370_v31, 2  ;;  %v1268_v56 = vrot.slane %v1267_v24, 1  ;;  %v1323_v49 = vmax.f32 %v1321_v7, %v1322_v50 }
 0x174   : > { %v1375_v53 = vmax.f32 %v4349_v37, %v4352_v8  ;;  %v1382_v11 = vmax.f32 %v4358_v45, %v4355_v23  ;;  %v4368_v44 = vmul.f32 1.442695, %v1433_v19  ;;  %v4370_v21 = vmax.f32 %v1309_v14, %v1310_v25  ;;  %v5447_v14 = vld [vmem:[#allocation14_spill] sm:$0xff] }
 0x175   : > { %v1365_v10 = vmax.f32 %v1363_v9, %v1364_v0  ;;  %v1372_v39 = vmax.f32 %v1370_v31, %v1371_v41  ;;  %v1317_v13 = vrot.slane %v1316_v51, 1  ;;  %v1329_v0 = vrot.slane %v1328_v30, 2  ;;  %v5449_v41 = vld [vmem:[#allocation15_spill] sm:$0xff] }
 0x176   : > { %v1376_v33 = vrot.slane %v1375_v53, 4  ;;  %v1383_v26 = vrot.slane %v1382_v11, 4  ;;  %5443 = vst [vmem:[#allocation61_spill] sm:$0xff] %v4370_v21  ;;  %v4374_v7 = vmax.f32 %v1267_v24, %v1268_v56  ;;  %v1324_v50 = vrot.slane %v1323_v49, 1 }
 0x177   : > { %v4364_v61 = vpop.f32.mrf.mxu2  ;;  %v4366_v2 = vpop.f32.mrf.mxu3  ;;  %v1366_v40 = vrot.slane %v1365_v10, 1  ;;  %v1373_v17 = vrot.slane %v1372_v39, 1  ;;  %v1457_v25 = vsub.f32 %v4232_v1, %v4370_v21  ;;  %v1330_v56 = vmax.f32 %v1328_v30, %v1329_v0 }
 0x178   : > { %v937_v55 = vpop.f32.mrf.mxu0  ;;  %v978_v57 = vpop.f32.mrf.mxu1  ;;  %v1377_v43 = vmax.f32 %v1375_v53, %v1376_v33  ;;  %v1384_v9 = vmax.f32 %v1382_v11, %v1383_v26  ;;  %5445 = vst [vmem:[#allocation63_spill] sm:$0xff] %v4374_v7  ;;  %v4396_v1 = vmax.f32 %v1274_v48, %v1275_v3 }
 0x179   : > { %v4372_v22 = vmax.f32 %v1365_v10, %v1366_v40  ;;  %v4378_v19 = vmax.f32 %v1372_v39, %v1373_v17  ;;  %v938_v53 = vadd.f32 %v937_v55, %v5447_v14  ;;  %v4383_v10 = vmax.f32 %v1316_v51, %v1317_v13  ;;  %v4386_v33 = vpop.eup %3156  ;;  %v5450_v17 = vld [vmem:[#allocation10_spill] sm:$0xff]  ;;  %v5452_v55 = vld [vmem:[#allocation11_spill] sm:$0xff] }
 0x17a   : > { %v1378_v59 = vrot.slane %v1377_v43, 2  ;;  %v1385_v62 = vrot.slane %v1384_v9, 2  ;;  %v979_v24 = vadd.f32 %v978_v57, %v5449_v41  ;;  %5451 = vst [vmem:[#allocation15_spill] sm:$0xff] %v4396_v1  ;;  %v976_v57 = vadd.f32 %v4336_v46, %v5452_v55  ;;  %v5454_v13 = vld [vmem:[#allocation46_spill] sm:$0xff] }
 0x17b   : > { %5444 = vst [vmem:[#allocation62_spill] sm:$0xff] %v4372_v22  ;;  %v1473_v31 = vsub.f32 %v4316_v20, %v4372_v22  ;;  %v1474_v20 = vsub.f32 %v4325_v34, %v4378_v19  ;;  %v4400_v39 = vmax.f32 %v1323_v49, %v1324_v50  ;;  %v1458_v48 = vsub.f32 %v4259_v58, %v4383_v10  ;;  %v5457_v50 = vld [vmem:[#allocation47_spill] sm:$0xff] }
 0x17c   : > { %5446 = vst [vmem:[#allocation64_spill] sm:$0xff] %v4378_v19  ;;  %v1379_v4 = vmax.f32 %v1377_v43, %v1378_v59  ;;  %v1386_v11 = vmax.f32 %v1384_v9, %v1385_v62  ;;  %v935_v59 = vadd.f32 %v4334_v18, %v5450_v17  ;;  %v4403_v9 = vadd.f32 %v5454_v13, %v938_v53  ;;  %v4405_v18 = vpop.eup %3158 }
 0x17d   : > { %5448 = vst [vmem:[#allocation14_spill] sm:$0xff] %v4383_v10  ;;  %v1593_v42 = vmul.f32 1.442695, %v1473_v31  ;;  %v1595_v34 = vmul.f32 1.442695, %v1474_v20  ;;  %v4414_v46 = vadd.f32 %v5454_v13, %v979_v24  ;;  %v1331_v49 = vrot.slane %v1330_v56, 1 }
 0x17e   : > { %v1380_v51 = vrot.slane %v1379_v4, 1  ;;  %v1387_v62 = vrot.slane %v1386_v11, 1  ;;  %5453 = vst [vmem:[#allocation10_spill] sm:$0xff] %v4400_v39  ;;  %v1561_v31 = vmul.f32 1.442695, %v1457_v25  ;;  %v4417_v14 = vadd.f32 %v5457_v50, %v935_v59 }
 0x17f   : > { %v4392_v43 = vpop.f32.mrf.mxu2  ;;  %v4394_v26 = vpop.f32.mrf.mxu3  ;;  %3160 = vpow2.f32 %v1593_v42  ;;  %v1465_v53 = vsub.f32 %v4313_v16, %v4372_v22  ;;  %v1459_v24 = vsub.f32 %v4276_v27, %v4400_v39  ;;  %v1563_v42 = vmul.f32 1.442695, %v1458_v48 }
 0x180   : > { %v940_v40 = vpop.f32.mrf.mxu0  ;;  %v981_v30 = vpop.f32.mrf.mxu1  ;;  %v4409_v3 = vmax.f32 %v1379_v4, %v1380_v51  ;;  %v4411_v0 = vmax.f32 %v1386_v11, %v1387_v62  ;;  %3162 = vpow2.f32 %v1595_v34  ;;  %v4426_v4 = vadd.f32 %v5457_v50, %v976_v57 }
 0x181   : > { %v1443_v11 = vsub.f32 %v4239_v5, %v4374_v7  ;;  %v1221_v16 = vmax.f32 %v4417_v14, %v4403_v9  ;;  %v1444_v59 = vsub.f32 %v4242_v63, %v4396_v1  ;;  %3164 = vpow2.f32 %v1561_v31 }
 0x182   : > { %5455 = vst [vmem:[#allocation11_spill] sm:$0xff] %v4409_v3  ;;  %v1475_v41 = vsub.f32 %v4352_v8, %v4409_v3  ;;  %v1476_v58 = vsub.f32 %v4355_v23, %v4411_v0  ;;  %v1228_v20 = vmax.f32 %v4426_v4, %v4414_v46  ;;  %v1466_v5 = vsub.f32 %v4321_v6, %v4378_v19  ;;  %v5459_v19 = vld [vmem:[#allocation18_spill] sm:$0xff] }
 0x183   : > { %5456 = vst [vmem:[#allocation46_spill] sm:$0xff] %v4411_v0  ;;  %v1449_v55 = vsub.f32 %v4245_v60, %v4370_v21  ;;  %v4450_v57 = vmax.f32 %v1330_v56, %v1331_v49  ;;  %v1577_v34 = vmul.f32 1.442695, %v1465_v53  ;;  %v1450_v63 = vsub.f32 %v4271_v12, %v4383_v10  ;;  %v5460_v53 = vld [vmem:[#allocation19_spill] sm:$0xff] }
 0x184   : > { %v1597_v23 = vmul.f32 1.442695, %v1475_v41  ;;  %v1599_v27 = vmul.f32 1.442695, %v1476_v58  ;;  %v1565_v31 = vmul.f32 1.442695, %v1459_v24  ;;  %v941_v60 = vadd.f32 %v940_v40, %v5459_v19 }
 0x185   : > { %v3161_v17 = vpop.eup %3160  ;;  %5458 = vst [vmem:[#allocation47_spill] sm:$0xff] %v4450_v57  ;;  %v1222_v6 = vrot.slane %v1221_v16, 4  ;;  %v4454_v8 = vmul.f32 1.442695, %v1443_v11  ;;  %v1229_v25 = vrot.slane %v1228_v20, 4  ;;  %v1467_v49 = vsub.f32 %v4349_v37, %v4409_v3  ;;  %v5463_v37 = vld [vmem:[#allocation16_spill] sm:$0xff] }
 0x186   : > { %3166 = vpow2.f32 %v1597_v23  ;;  %1626 = vmatpush.msra.mxu0 %v3161_v17  ;;  %v3163_v41 = vpop.eup %3162  ;;  %v1579_v56 = vmul.f32 1.442695, %v1466_v5  ;;  %v982_v23 = vadd.f32 %v981_v30, %v5460_v53  ;;  %v5461_v17 = vld [vmem:[#allocation22_spill] sm:$0xff]  ;;  %v1545_v12 = vmul.f32 1.442695, %v1449_v55 }
 0x187   : > { %v4444_v51 = vpop.f32.mrf.mxu2  ;;  %v4446_v62 = vpop.f32.mrf.mxu3  ;;  %3168 = vpow2.f32 %v1599_v27  ;;  %1649 = vmatpush.msra.mxu1 %v3163_v41  ;;  %v1460_v24 = vsub.f32 %v4300_v38, %v4450_v57  ;;  %v5462_v27 = vld [vmem:[#allocation23_spill] sm:$0xff]  ;;  %v1547_v10 = vmul.f32 1.442695, %v1450_v63  ;;  %v1468_v19 = vsub.f32 %v4358_v45, %v4411_v0  ;;  %v5471_v0 = vld [vmem:[#allocation52_spill] sm:$0xff] }
 0x188   : > { %v943_v48 = vpop.f32.mrf.mxu0  ;;  %v984_v58 = vpop.f32.mrf.mxu1  ;;  %3170 = vpow2.f32 %v1563_v42  ;;  %v1223_v40 = vmax.f32 %v1221_v16, %v1222_v6  ;;  %v1020_v30 = vadd.f32 %v4392_v43, %v5463_v37  ;;  %v1581_v41 = vmul.f32 1.442695, %v1467_v49  ;;  %v5465_v49 = vld [vmem:[#allocation24_spill] sm:$0xff] }
 0x189   : > { %v944_v22 = vadd.f32 %v943_v48, %v5461_v17  ;;  %v985_v11 = vadd.f32 %v984_v58, %v5462_v27  ;;  %3172 = vpow2.f32 %v1577_v34  ;;  %v3165_v42 = vpop.eup %3164  ;;  %v4469_v48 = vadd.f32 %v4164_v32, %v941_v60  ;;  %v5464_v58 = vld [vmem:[#allocation12_spill] sm:$0xff] }
 0x18a   : > { %3174 = vpow2.f32 %v1565_v31  ;;  %v1230_v63 = vmax.f32 %v1228_v20, %v1229_v25  ;;  %v4478_v31 = vadd.f32 %v4164_v32, %v982_v23  ;;  %v1567_v6 = vmul.f32 1.442695, %v1460_v24  ;;  %v5467_v37 = vld [vmem:[#allocation20_spill] sm:$0xff] }
 0x18b   : > { %v4472_v55 = vadd.f32 %v4184_v28, %v944_v22  ;;  %v4475_v38 = vadd.f32 %v4184_v28, %v985_v11  ;;  %3176 = vpow2.f32 %v1579_v56  ;;  %v1017_v60 = vadd.f32 %v4364_v61, %v5464_v58  ;;  %v5466_v61 = vld [vmem:[#allocation17_spill] sm:$0xff] }
 0x18c   : > { %v3167_v5 = vpop.eup %3166  ;;  %3178 = vpow2.f32 %v1545_v12  ;;  %v1583_v25 = vmul.f32 1.442695, %v1468_v19  ;;  %v1224_v20 = vrot.slane %v1223_v40, 2  ;;  %v1535_v27 = vmul.f32 1.442695, %v1444_v59 }
 0x18d   : > { %v3169_v34 = vpop.eup %3168  ;;  %1672 = vmatpush.msra.mxu2 %v3167_v5  ;;  %v1277_v22 = vmax.f32 %v4469_v48, %v4472_v55  ;;  %v1284_v56 = vmax.f32 %v4478_v31, %v4475_v38  ;;  %v4490_v24 = vadd.f32 %v5454_v13, %v1020_v30  ;;  %v1061_v11 = vadd.f32 %v4394_v26, %v5466_v61 }
 0x18e   : > { %v3171_v43 = vpop.eup %3170  ;;  %1695 = vmatpush.msra.mxu3 %v3169_v34  ;;  %3180 = vpow2.f32 %v1547_v10  ;;  %v1231_v5 = vrot.slane %v1230_v63, 2  ;;  %v1023_v19 = vadd.f32 %v4444_v51, %v5467_v37  ;;  %v1198_v58 = vrot.slane %v4278_v35, 1  ;;  %v5469_v10 = vld [vmem:[#allocation13_spill] sm:$0xff] }
 0x18f   : > { %v1025_v45 = vpop.f32.mrf.mxu2  ;;  %v1066_v16 = vpop.f32.mrf.mxu3  ;;  %v1278_v34 = vrot.slane %v1277_v22, 4  ;;  %3182 = vpow2.f32 %v1581_v41  ;;  %v1285_v59 = vrot.slane %v1284_v56, 4  ;;  %v1225_v61 = vmax.f32 %v1223_v40, %v1224_v20  ;;  %v5472_v40 = vld [vmem:[#allocation21_spill] sm:$0xff] }
 0x190   : > { %v4484_v53 = vpop.f32.mrf.mxu0  ;;  %v1026_v23 = vadd.f32 %v1025_v45, %v5465_v49  ;;  %v3173_v17 = vpop.eup %3172  ;;  %3184 = vpow2.f32 %v1567_v6  ;;  %v4499_v45 = vadd.f32 %v5457_v50, %v1017_v60  ;;  %v1058_v49 = vadd.f32 %v4366_v2, %v5469_v10 }
 0x191   : > { %v4494_v12 = vpop.eup %3174  ;;  %1627 = vmatpush.msra.mxu0 %v3173_v17  ;;  %v4501_v30 = vpop.f32.mrf.mxu1  ;;  %3186 = vpow2.f32 %v1583_v25  ;;  %v4512_v60 = vadd.f32 %v5454_v13, %v1061_v11  ;;  %v5470_v17 = vld [vmem:[#allocation25_spill] sm:$0xff]  ;;  %v1434_v3 = vsub.f32 %v5471_v0, %v4310_v15  ;;  %v1232_v2 = vmax.f32 %v1230_v63, %v1231_v5 }
 0x192   : > { %5468 = vst [vmem:[#allocation18_spill] sm:$0xff] %v4499_v45  ;;  %v3177_v26 = vpop.eup %3176  ;;  %v4507_v51 = vadd.f32 %v4184_v28, %v1026_v23  ;;  %v1235_v6 = vmax.f32 %v4499_v45, %v4490_v24  ;;  %v1067_v37 = vadd.f32 %v1066_v16, %v5470_v17  ;;  %v1064_v25 = vadd.f32 %v4446_v62, %v5472_v40 }
 0x193   : > { %1628 = vmatpush.msra.mxu0 %v3165_v42  ;;  %v3179_v41 = vpop.eup %3178  ;;  %1650 = vmatpush.msra.mxu1 %v3177_v26  ;;  %v4518_v42 = vadd.f32 %v4164_v32, %v1023_v19  ;;  %v1279_v20 = vmax.f32 %v1277_v22, %v1278_v34  ;;  %v5473_v16 = vsub.f32 %v4251_v47, %v4374_v7  ;;  %3188 = vpow2.f32 %v4454_v8 }
 0x194   : > { %v3181_v13 = vpop.eup %3180  ;;  %v1286_v0 = vmax.f32 %v1284_v56, %v1285_v59  ;;  %v4533_v63 = vmax.f32 %v4278_v35, %v1198_v58  ;;  %v1451_v5 = vsub.f32 %v4289_v52, %v4400_v39  ;;  %v4540_v19 = vadd.f32 %v5457_v50, %v1058_v49 }
 0x195   : > { %1629 = vmatpush.msra.mxu0 %v3179_v41  ;;  %v4529_v11 = vmul.f32 1.442695, %v5473_v16  ;;  %1651 = vmatpush.msra.mxu1 %v3171_v43  ;;  %v3183_v22 = vpop.eup %3182  ;;  %v1226_v34 = vrot.slane %v1225_v61, 1  ;;  %v1291_v47 = vmax.f32 %v4518_v42, %v4507_v51  ;;  %3190 = vpow2.f32 %v1535_v27  ;;  %v5478_v16 = vld [vmem:[#allocation50_spill] sm:$0xff] }
 0x196   : > { %5474 = vst [vmem:[#allocation19_spill] sm:$0xff] %v4533_v63  ;;  %v3185_v8 = vpop.eup %3184  ;;  %v1236_v43 = vrot.slane %v1235_v6, 4  ;;  %v4546_v35 = vadd.f32 %v4184_v28, %v1067_v37  ;;  %1673 = vmatpush.msra.mxu2 %v3183_v22  ;;  %v1515_v56 = vmul.f32 1.442695, %v1434_v3  ;;  %v1233_v52 = vrot.slane %v1232_v2, 1  ;;  %v5476_v28 = vld [vmem:[#allocation48_spill] sm:$0xff] }
 0x197   : > { %v4522_v23 = vpop.f32.mrf.mxu2  ;;  %v4524_v10 = vpop.f32.mrf.mxu3  ;;  %5475 = vst [vmem:[#allocation22_spill] sm:$0xff] %v4540_v19  ;;  %1630 = vmatpush.msra.mxu0 %v4386_v33  ;;  %1652 = vmatpush.msra.mxu1 %v3181_v13  ;;  %v1242_v50 = vmax.f32 %v4540_v19, %v4512_v60  ;;  %v4551_v58 = vadd.f32 %v4164_v32, %v1064_v25  ;;  %v1280_v26 = vrot.slane %v1279_v20, 2  ;;  %v1287_v49 = vrot.slane %v1286_v0, 2 }
 0x198   : > { %v4535_v62 = vpop.f32.mrf.mxu0  ;;  %v3187_v59 = vpop.eup %3186  ;;  %3192 = vpow2.f32 %v4368_v44  ;;  %v1425_v33 = vsub.f32 %v5476_v28, %v4533_v63  ;;  %v1205_v3 = vrot.slane %v4284_v54, 1  ;;  %v1549_v27 = vmul.f32 1.442695, %v1451_v5  ;;  %1674 = vmatpush.msra.mxu2 %v4494_v12 }
 0x199   : > { %1653 = vmatpush.msra.mxu1 %v4405_v18  ;;  %1696 = vmatpush.msra.mxu3 %v3187_v59  ;;  %v1452_v41 = vsub.f32 %v4308_v29, %v4450_v57  ;;  %v4560_v17 = vmax.f32 %v1225_v61, %v1226_v34  ;;  %v1292_v32 = vrot.slane %v1291_v47, 4  ;;  %v4563_v37 = vpop.eup %3188  ;;  %v1298_v18 = vmax.f32 %v4551_v58, %v4546_v35  ;;  %v990_v25 = vpop.f32.mrf.mxu1 }
 0x19a   : > { %3194 = vpow2.f32 %v1515_v56  ;;  %v1497_v44 = vmul.f32 1.442695, %v1425_v33  ;;  %v4568_v40 = vmax.f32 %v4284_v54, %v1205_v3  ;;  %v4570_v13 = vmax.f32 %v1235_v6, %v1236_v43 }
 0x19b   : > { %1697 = vmatpush.msra.mxu3 %v3185_v8  ;;  %v1243_v29 = vrot.slane %v1242_v50, 4  ;;  %v1281_v61 = vmax.f32 %v1279_v20, %v1280_v26  ;;  %v1417_v22 = vsub.f32 %v5478_v16, %v4533_v63  ;;  %v4574_v5 = vpop.eup %3190  ;;  %v4576_v34 = vmax.f32 %v1232_v2, %v1233_v52  ;;  %v5479_v8 = vld [vmem:[#allocation51_spill] sm:$0xff]  ;;  %v5481_v2 = vld [vmem:[#allocation26_spill] sm:$0xff] }
 0x19c   : > { %5477 = vst [vmem:[#allocation23_spill] sm:$0xff] %v4568_v40  ;;  %v1288_v59 = vmax.f32 %v1286_v0, %v1287_v49  ;;  %3196 = vpow2.f32 %v1497_v44  ;;  %v1426_v56 = vsub.f32 %v5479_v8, %v4568_v40  ;;  %v5480_v6 = vsub.f32 %v4254_v36, %v4396_v1  ;;  %v5482_v16 = vld [vmem:[#allocation27_spill] sm:$0xff]  ;;  %v5498_v1 = vld [vmem:[#allocation38_spill] sm:$0xff] }
 0x19d   : > { %v1429_v20 = vsub.f32 %v4403_v9, %v4560_v17  ;;  %v1293_v26 = vmax.f32 %v1291_v47, %v1292_v32  ;;  %3198 = vpow2.f32 %v1549_v27  ;;  %v1551_v33 = vmul.f32 1.442695, %v1452_v41 }
 0x19e   : > { %v1519_v43 = vmul.f32 1.442695, %v5480_v6  ;;  %v3193_v28 = vpop.eup %3192  ;;  %v1299_v3 = vrot.slane %v1298_v18, 4  ;;  %v947_v0 = vadd.f32 %v4484_v53, %v5481_v2  ;;  %v1499_v52 = vmul.f32 1.442695, %v1426_v56  ;;  %v5483_v6 = vld [vmem:[#allocation53_spill] sm:$0xff] }
 0x19f   : > { %v1031_v12 = vpop.f32.mrf.mxu2  ;;  %v1072_v54 = vpop.f32.mrf.mxu3  ;;  %v1282_v44 = vrot.slane %v1281_v61, 1  ;;  %v988_v8 = vadd.f32 %v4501_v30, %v5482_v16  ;;  %1631 = vmatpush.msra.mxu0 %v3193_v28  ;;  %v1481_v36 = vmul.f32 1.442695, %v1417_v22  ;;  %v1418_v57 = vsub.f32 %v5483_v6, %v4568_v40  ;;  %v5484_v30 = vld [vmem:[#allocation28_spill] sm:$0xff] }
 0x1a0   : > { %v952_v49 = vpop.f32.mrf.mxu0  ;;  %v3195_v9 = vpop.eup %3194  ;;  %v4594_v41 = vmax.f32 %v1242_v50, %v1243_v29  ;;  %v1289_v53 = vrot.slane %v1288_v59, 1  ;;  %v4596_v32 = vmul.f32 1.442695, %v1429_v20  ;;  %v1294_v56 = vrot.slane %v1293_v26, 2  ;;  %v5485_v16 = vld [vmem:[#allocation40_spill] sm:$0xff] }
 0x1a1   : > { %1654 = vmatpush.msra.mxu1 %v3195_v9  ;;  %3200 = vpow2.f32 %v1499_v52  ;;  %v1029_v22 = vadd.f32 %v4522_v23, %v5484_v30  ;;  %v4600_v2 = vmax.f32 %v1298_v18, %v1299_v3  ;;  %v4603_v6 = vadd.f32 %v5485_v16, %v947_v0  ;;  %v993_v27 = vpop.f32.mrf.mxu1  ;;  %v5486_v52 = vld [vmem:[#allocation29_spill] sm:$0xff]  ;;  %v5487_v3 = vld [vmem:[#allocation30_spill] sm:$0xff]  ;;  %v5489_v30 = vld [vmem:[#allocation32_spill] sm:$0xff] }
 0x1a2   : > { %v3197_v28 = vpop.eup %3196  ;;  %3202 = vpow2.f32 %v1551_v33  ;;  %v1483_v47 = vmul.f32 1.442695, %v1418_v57  ;;  %v4605_v29 = vmax.f32 %v1281_v61, %v1282_v44  ;;  %v4608_v20 = vadd.f32 %v5485_v16, %v988_v8  ;;  %v5488_v57 = vld [vmem:[#allocation31_spill] sm:$0xff] }
 0x1a3   : > { %v3199_v50 = vpop.eup %3198  ;;  %1632 = vmatpush.msra.mxu0 %v3197_v28  ;;  %3204 = vpow2.f32 %v1481_v36  ;;  %v1070_v23 = vadd.f32 %v4524_v10, %v5486_v52  ;;  %v4612_v18 = vmax.f32 %v1288_v59, %v1289_v53  ;;  %v950_v33 = vadd.f32 %v4535_v62, %v5487_v3  ;;  %v5490_v28 = vld [vmem:[#allocation33_spill] sm:$0xff]  ;;  %v5491_v52 = vld [vmem:[#allocation34_spill] sm:$0xff]  ;;  %v5492_v53 = vld [vmem:[#allocation44_spill] sm:$0xff] }
 0x1a4   : > { %1675 = vmatpush.msra.mxu2 %v3199_v50  ;;  %v991_v0 = vadd.f32 %v990_v25, %v5488_v57  ;;  %v1032_v61 = vadd.f32 %v1031_v12, %v5489_v30  ;;  %v4620_v8 = vmax.f32 %v1293_v26, %v1294_v56  ;;  %v4623_v36 = vadd.f32 %v5485_v16, %v1029_v22 }
 0x1a5   : > { %v1073_v10 = vadd.f32 %v1072_v54, %v5490_v28  ;;  %v953_v59 = vadd.f32 %v952_v49, %v5491_v52  ;;  %3206 = vpow2.f32 %v1483_v47  ;;  %v4629_v62 = vadd.f32 %v5492_v53, %v950_v33  ;;  %v4647_v49 = vld [vmem:[%s5341_s4] sm:$0xff]  ;;  %v5493_v33 = vld [vmem:[#allocation41_spill] sm:$0xff]  ;;  %v5495_v28 = vld [vmem:[#allocation56_spill] sm:$0xff] }
 0x1a6   : > { %1676 = vmatpush.msra.mxu2 %v4563_v37  ;;  %v4632_v25 = vadd.f32 %v5492_v53, %v991_v0  ;;  %v4635_v12 = vadd.f32 %v5492_v53, %v1032_v61  ;;  %v4638_v56 = vadd.f32 %v5485_v16, %v1070_v23  ;;  %3208 = vpow2.f32 %v4529_v11 }
 0x1a7   : > { %v1034_v9 = vpop.f32.mrf.mxu2  ;;  %v4618_v44 = vpop.f32.mrf.mxu3  ;;  %v4642_v54 = vadd.f32 %v5492_v53, %v1073_v10  ;;  %3210 = vpow2.f32 %v1519_v43  ;;  %v1333_v47 = vmax.f32 %v4603_v6, %v4629_v62  ;;  %v1296_v23 = vrot.slane %v4620_v8, 1  ;;  %v5494_v43 = vld [vmem:[#allocation35_spill] sm:$0xff]  ;;  %v5496_v53 = vld [vmem:[#allocation57_spill] sm:$0xff] }
 0x1a8   : > { %v3201_v26 = vpop.eup %3200  ;;  %v1340_v22 = vmax.f32 %v4608_v20, %v4632_v25  ;;  %v1347_v11 = vmax.f32 %v4623_v36, %v4635_v12  ;;  %v955_v16 = vpop.f32.mrf.mxu0  ;;  %v4659_v57 = vadd.f32 %v5493_v33, %v953_v59  ;;  %v994_v0 = vadd.f32 %v993_v27, %v5494_v43 }
 0x1a9   : > { %v3203_v37 = vpop.eup %3202  ;;  %1655 = vmatpush.msra.mxu1 %v3201_v26  ;;  %v1354_v3 = vmax.f32 %v4638_v56, %v4642_v54  ;;  %v1334_v30 = vrot.slane %v1333_v47, 4  ;;  %3212 = vpow2.f32 %v5495_v28  ;;  %v996_v52 = vpop.f32.mrf.mxu1  ;;  %v956_v39 = vadd.f32 %v955_v16, %v5498_v1  ;;  %v5499_v28 = vld [vmem:[#allocation39_spill] sm:$0xff] }
 0x1aa   : > { %v3205_v50 = vpop.eup %3204  ;;  %1698 = vmatpush.msra.mxu3 %v3203_v37  ;;  %v1341_v61 = vrot.slane %v1340_v22, 4  ;;  %v1348_v10 = vrot.slane %v1347_v11, 4  ;;  %3214 = vpow2.f32 %v5496_v53  ;;  %v5497_v37 = vld [vmem:[#allocation36_spill] sm:$0xff]  ;;  %v997_v40 = vadd.f32 %v996_v52, %v5499_v28  ;;  %v5500_v53 = vld [vmem:[#allocation45_spill] sm:$0xff]  ;;  %v4701_v28 = vld [vmem:[%s5341_s4 + $0x8] sm:$0xff] }
 0x1ab   : > { %1633 = vmatpush.msra.mxu0 %v3205_v50  ;;  %v1355_v26 = vrot.slane %v1354_v3, 4  ;;  %v1035_v59 = vadd.f32 %v1034_v9, %v5497_v37  ;;  %v3207_v50 = vpop.eup %3206  ;;  %v1335_v43 = vmax.f32 %v1333_v47, %v1334_v30  ;;  %v4671_v19 = vadd.f32 %v5493_v33, %v994_v0  ;;  %v5501_v9 = vld [vmem:[#allocation42_spill] sm:$0xff]  ;;  %v5502_v30 = vld [vmem:[#allocation43_spill] sm:$0xff] }
 0x1ac   : > { %1699 = vmatpush.msra.mxu3 %v4574_v5  ;;  %2996 = vmatmul.msk.f32.vlgmr.msra.gmra.mxu0 %vm1611_vm1, %v4647_v49  ;;  %v1342_v7 = vmax.f32 %v1340_v22, %v1341_v61  ;;  %v1349_v15 = vmax.f32 %v1347_v11, %v1348_v10  ;;  %v3209_v63 = vpop.eup %3208  ;;  %v4674_v45 = vadd.f32 %v5500_v53, %v956_v39  ;;  %3216 = vpow2.f32 %v4596_v32 }
 0x1ad   : > { %1656 = vmatpush.msra.mxu1 %v3207_v50  ;;  %v1356_v5 = vmax.f32 %v1354_v3, %v1355_v26  ;;  %v3211_v1 = vpop.eup %3210  ;;  %1677 = vmatpush.msra.mxu2 %v3209_v63  ;;  %v1336_v47 = vrot.slane %v1335_v43, 2  ;;  %v4680_v16 = vadd.f32 %v5500_v53, %v997_v40  ;;  %v4683_v3 = vadd.f32 %v5493_v33, %v1035_v59  ;;  %v5503_v40 = vld [vmem:[#allocation60_spill] sm:$0xff]  ;;  %v5504_v50 = vld [vmem:[#allocation49_spill] sm:$0xff] }
 0x1ae   : > { %2998 = vmatmul.msk.f32.vlgmr.msra.gmra.mxu1 %vm1611_vm1, %v4647_v49  ;;  %v1343_v22 = vrot.slane %v1342_v7, 2  ;;  %v1350_v11 = vrot.slane %v1349_v15, 2  ;;  %1700 = vmatpush.msra.mxu3 %v3211_v1  ;;  %v1389_v39 = vmax.f32 %v4659_v57, %v4674_v45  ;;  %v4692_v63 = vmax.f32 %v4620_v8, %v1296_v23 }
 0x1af   : > { %v1037_v27 = vpop.f32.mrf.mxu2  ;;  %v1078_v21 = vpop.f32.mrf.mxu3  ;;  %v1337_v52 = vmax.f32 %v1335_v43, %v1336_v47  ;;  %1678 = vmatpush.msra.mxu2 %v5503_v40  ;;  %v1396_v59 = vmax.f32 %v4671_v19, %v4680_v16  ;;  %v1445_v43 = vsub.f32 %v4472_v55, %v4605_v29 }
 0x1b0   : > { %v1038_v37 = vadd.f32 %v1037_v27, %v5501_v9  ;;  %v1079_v61 = vadd.f32 %v1078_v21, %v5502_v30  ;;  %v3213_v10 = vpop.eup %3212  ;;  %v1344_v26 = vmax.f32 %v1342_v7, %v1343_v22  ;;  %1701 = vmatpush.msra.mxu3 %v5504_v50  ;;  %v1357_v21 = vrot.slane %v1356_v5, 2  ;;  %v5505_v9 = vld [vmem:[#allocation37_spill] sm:$0xff] }
 0x1b1   : > { %v3215_v27 = vpop.eup %3214  ;;  %v1076_v8 = vadd.f32 %v4618_v44, %v5505_v9  ;;  %v1390_v23 = vrot.slane %v1389_v39, 4  ;;  %v1338_v1 = vrot.slane %v1337_v52, 1  ;;  %1679 = vmatpush.msra.mxu2 %v3213_v10  ;;  %v1351_v47 = vmax.f32 %v1349_v15, %v1350_v11 }
 0x1b2   : > { %v4688_v0 = vadd.f32 %v5500_v53, %v1038_v37  ;;  %v1446_v37 = vsub.f32 %v4475_v38, %v4612_v18  ;;  %1702 = vmatpush.msra.mxu3 %v3215_v27  ;;  %3000 = vmatmul.msk.f32.vlgmr.msra.gmra.mxu2 %vm1611_vm1, %v4647_v49  ;;  %v1397_v30 = vrot.slane %v1396_v59, 4  ;;  %v4714_v40 = vadd.f32 %v5500_v53, %v1079_v61 }
 0x1b3   : > { %v1391_v22 = vmax.f32 %v1389_v39, %v1390_v23  ;;  %v5506_v50 = vsub.f32 %v4414_v46, %v4576_v34  ;;  %v5507_v9 = vrot.slane %v4570_v13, 2  ;;  %v1447_v15 = vsub.f32 %v4507_v51, %v4692_v63  ;;  %3002 = vmatmul.msk.f32.vlgmr.msra.gmra.mxu3 %vm1611_vm1, %v4647_v49 }
 0x1b4   : > { %v1403_v7 = vmax.f32 %v4683_v3, %v4688_v0  ;;  %v1345_v11 = vrot.slane %v1344_v26, 1  ;;  %2997 = vmatmul.msk.f32.gmra.mxu0 %vm1611_vm1, %v4701_v28  ;;  %v1301_v53 = vrot.slane %v4600_v2, 2  ;;  %v1358_v39 = vmax.f32 %v1356_v5, %v1357_v21 }
 0x1b5   : > { %v1507_v55 = vmul.f32 1.442695, %v5506_v50  ;;  %v4722_v38 = vmax.f32 %v4570_v13, %v5507_v9  ;;  %v4732_v46 = vadd.f32 %v5493_v33, %v1076_v8  ;;  %v1392_v61 = vrot.slane %v1391_v22, 2 }
 0x1b6   : > { %v1404_v44 = vrot.slane %v1403_v7, 4  ;;  %v1537_v13 = vmul.f32 1.442695, %v1445_v43  ;;  %v4735_v10 = vmax.f32 %v1337_v52, %v1338_v1  ;;  %2999 = vmatmul.msk.f32.gmra.mxu1 %vm1611_vm1, %v4701_v28  ;;  %v1352_v51 = vrot.slane %v1351_v47, 1 }
 0x1b7   : > { %v1539_v27 = vmul.f32 1.442695, %v1446_v37  ;;  %v1398_v23 = vmax.f32 %v1396_v59, %v1397_v30  ;;  %v1410_v9 = vmax.f32 %v4732_v46, %v4714_v40  ;;  %v1437_v33 = vsub.f32 %v4469_v48, %v4605_v29 }
 0x1b8   : > { %v1405_v50 = vmax.f32 %v1403_v7, %v1404_v44  ;;  %v1541_v5 = vmul.f32 1.442695, %v1447_v15  ;;  %v4743_v21 = vmax.f32 %v1344_v26, %v1345_v11  ;;  %v1393_v32 = vmax.f32 %v1391_v22, %v1392_v61  ;;  %v4753_v22 = vpop.eup %3216 }
 0x1b9   : > { %3218 = vpow2.f32 %v1507_v55  ;;  %v1245_v52 = vrot.slane %v4594_v41, 2  ;;  %v1302_v8 = vmax.f32 %v4600_v2, %v1301_v53  ;;  %v1359_v43 = vrot.slane %v1358_v39, 1 }
 0x1ba   : > { %3220 = vpow2.f32 %v1537_v13  ;;  %v1461_v59 = vsub.f32 %v4629_v62, %v4735_v10  ;;  %v4749_v7 = vmax.f32 %v1351_v47, %v1352_v51  ;;  %v1394_v37 = vrot.slane %v1393_v32, 1  ;;  %3001 = vmatmul.msk.f32.gmra.mxu2 %vm1611_vm1, %v4701_v28 }
 0x1bb   : > { %3222 = vpow2.f32 %v1539_v27  ;;  %v1399_v48 = vrot.slane %v1398_v23, 2  ;;  %v1406_v26 = vrot.slane %v1405_v50, 2  ;;  %v1411_v1 = vrot.slane %v1410_v9, 4  ;;  %3003 = vmatmul.msk.f32.gmra.mxu3 %vm1611_vm1, %v4701_v28 }
 0x1bc   : > { %v1521_v30 = vmul.f32 1.442695, %v1437_v33  ;;  %3224 = vpow2.f32 %v1541_v5  ;;  %v1462_v2 = vsub.f32 %v4632_v25, %v4743_v21  ;;  %v4759_v62 = vmax.f32 %v1393_v32, %v1394_v37 }
 0x1bd   : > { %v4761_v47 = vmax.f32 %v1358_v39, %v1359_v43  ;;  %v1400_v44 = vmax.f32 %v1398_v23, %v1399_v48  ;;  %v1407_v55 = vmax.f32 %v1405_v50, %v1406_v26  ;;  %v1412_v15 = vmax.f32 %v1410_v9, %v1411_v1 }
 0x1be   : > { %v1569_v11 = vmul.f32 1.442695, %v1461_v59  ;;  %v1463_v53 = vsub.f32 %v4635_v12, %v4749_v7  ;;  %v1469_v61 = vsub.f32 %v4659_v57, %v4759_v62  ;;  %v1477_v25 = vsub.f32 %v4674_v45, %v4759_v62 }
 0x1bf   : > { %v4769_v13 = vpop.eup %3218  ;;  %v1453_v51 = vsub.f32 %v4603_v6, %v4735_v10  ;;  %v1401_v39 = vrot.slane %v1400_v44, 1  ;;  %v1408_v27 = vrot.slane %v1407_v55, 1  ;;  %v1413_v23 = vrot.slane %v1412_v15, 2 }
 0x1c0   : > { %v4773_v50 = vpop.eup %3220  ;;  %v1240_v9 = vrot.slane %v4722_v38, 1  ;;  %v1571_v33 = vmul.f32 1.442695, %v1462_v2  ;;  %v1601_v12 = vmul.f32 1.442695, %v1477_v25  ;;  %3226 = vpow2.f32 %v1521_v30 }
 0x1c1   : > { %v4776_v5 = vpop.eup %3222  ;;  %v1585_v57 = vmul.f32 1.442695, %v1469_v61  ;;  %v4778_v32 = vmax.f32 %v1400_v44, %v1401_v39  ;;  %v4780_v45 = vmax.f32 %v1407_v55, %v1408_v27  ;;  %v1414_v43 = vmax.f32 %v1412_v15, %v1413_v23 }
 0x1c2   : > { %v4782_v59 = vpop.eup %3224  ;;  %v1303_v6 = vrot.slane %v1302_v8, 1  ;;  %3228 = vpow2.f32 %v1569_v11  ;;  %v1573_v37 = vmul.f32 1.442695, %v1463_v53  ;;  %v1464_v48 = vsub.f32 %v4642_v54, %v4761_v47 }
 0x1c3   : > { %v1553_v26 = vmul.f32 1.442695, %v1453_v51  ;;  %3230 = vpow2.f32 %v1601_v12  ;;  %v1470_v1 = vsub.f32 %v4671_v19, %v4778_v32  ;;  %v1478_v30 = vsub.f32 %v4680_v16, %v4778_v32 }
 0x1c4   : > { %3232 = vpow2.f32 %v1571_v33  ;;  %v1471_v2 = vsub.f32 %v4683_v3, %v4780_v45  ;;  %v1479_v44 = vsub.f32 %v4688_v0, %v4780_v45  ;;  %v1415_v55 = vrot.slane %v1414_v43, 1 }
 0x1c5   : > { %v1246_v15 = vmax.f32 %v4594_v41, %v1245_v52  ;;  %3234 = vpow2.f32 %v1585_v57  ;;  %v1587_v54 = vmul.f32 1.442695, %v1470_v1  ;;  %v1603_v11 = vmul.f32 1.442695, %v1478_v30 }
 0x1c6   : > { %v4795_v53 = vpop.eup %3226  ;;  %v1454_v19 = vsub.f32 %v4608_v20, %v4743_v21  ;;  %3236 = vpow2.f32 %v1573_v37  ;;  %v1605_v16 = vmul.f32 1.442695, %v1479_v44  ;;  %v4799_v61 = vmax.f32 %v1414_v43, %v1415_v55 }
 0x1c7   : > { %v4801_v25 = vmax.f32 %v1302_v8, %v1303_v6  ;;  %v1455_v3 = vsub.f32 %v4623_v36, %v4749_v7  ;;  %v1575_v0 = vmul.f32 1.442695, %v1464_v48  ;;  %3238 = vpow2.f32 %v1553_v26 }
 0x1c8   : > { %v3229_v41 = vpop.eup %3228  ;;  %3240 = vpow2.f32 %v1603_v11  ;;  %v1589_v52 = vmul.f32 1.442695, %v1471_v2  ;;  %v1472_v51 = vsub.f32 %v4732_v46, %v4799_v61  ;;  %v1480_v20 = vsub.f32 %v4714_v40, %v4799_v61 }
 0x1c9   : > { %v3231_v39 = vpop.eup %3230  ;;  %v1421_v27 = vsub.f32 %v4417_v14, %v4560_v17  ;;  %v1247_v8 = vrot.slane %v1246_v15, 1  ;;  %3242 = vpow2.f32 %v1587_v54  ;;  %v1438_v36 = vsub.f32 %v4478_v31, %v4612_v18 }
 0x1ca   : > { %v3233_v23 = vpop.eup %3232  ;;  %v1555_v33 = vmul.f32 1.442695, %v1454_v19  ;;  %3244 = vpow2.f32 %v1605_v16  ;;  %v1607_v12 = vmul.f32 1.442695, %v1480_v20  ;;  %1718 = vmatpush.msrb.mxu0 %v3231_v39  ;;  %v1456_v46 = vsub.f32 %v4638_v56, %v4761_v47  ;;  %v5508_v19 = vld [vmem:[#allocation18_spill] sm:$0xff] }
 0x1cb   : > { %v3235_v57 = vpop.eup %3234  ;;  %3246 = vpow2.f32 %v1575_v0  ;;  %v1591_v40 = vmul.f32 1.442695, %v1472_v51  ;;  %v4816_v6 = vmax.f32 %v4722_v38, %v1240_v9  ;;  %v1448_v14 = vsub.f32 %v4546_v35, %v4801_v25 }
 0x1cc   : > { %v3237_v43 = vpop.eup %3236  ;;  %v1557_v37 = vmul.f32 1.442695, %v1455_v3  ;;  %3248 = vpow2.f32 %v1589_v52  ;;  %1719 = vmatpush.msrb.mxu0 %v3235_v57  ;;  %v1489_v48 = vmul.f32 1.442695, %v1421_v27  ;;  %v4820_v26 = vmax.f32 %v1246_v15, %v1247_v8  ;;  %v5509_v3 = vld [vmem:[#allocation22_spill] sm:$0xff] }
 0x1cd   : > { %v3239_v31 = vpop.eup %3238  ;;  %v1439_v1 = vsub.f32 %v4518_v42, %v4692_v63  ;;  %3250 = vpow2.f32 %v1607_v12  ;;  %v1422_v30 = vsub.f32 %v4426_v4, %v4576_v34  ;;  %v1523_v38 = vmul.f32 1.442695, %v1438_v36  ;;  %v5511_v36 = vld [vmem:[#allocation58_spill] sm:$0xff] }
 0x1ce   : > { %v3241_v56 = vpop.eup %3240  ;;  %1720 = vmatpush.msrb.mxu0 %v3229_v41  ;;  %3252 = vpow2.f32 %v1555_v33  ;;  %v1440_v35 = vsub.f32 %v4551_v58, %v4801_v25  ;;  %v1559_v2 = vmul.f32 1.442695, %v1456_v46  ;;  %v1431_v55 = vsub.f32 %v4490_v24, %v4816_v6  ;;  %v5513_v46 = vld [vmem:[#allocation62_spill] sm:$0xff] }
 0x1cf   : > { %v3243_v9 = vpop.eup %3242  ;;  %3254 = vpow2.f32 %v1591_v40  ;;  %1741 = vmatpush.msrb.mxu1 %v3241_v56  ;;  %v1543_v42 = vmul.f32 1.442695, %v1448_v14  ;;  %v1432_v4 = vsub.f32 %v4512_v60, %v4820_v26  ;;  %v1525_v54 = vmul.f32 1.442695, %v1439_v1  ;;  %v5516_v56 = vld [vmem:[#allocation14_spill] sm:$0xff] }
 0x1d0   : > { %v3245_v44 = vpop.eup %3244  ;;  %1721 = vmatpush.msrb.mxu0 %v3239_v31  ;;  %3256 = vpow2.f32 %v1557_v37  ;;  %v1491_v58 = vmul.f32 1.442695, %v1422_v30  ;;  %v1423_v16 = vsub.f32 %v5508_v19, %v4816_v6  ;;  %v1424_v0 = vsub.f32 %v5509_v3, %v4820_v26  ;;  %v5514_v31 = vld [vmem:[#allocation23_spill] sm:$0xff] }
 0x1d1   : > { %v3247_v15 = vpop.eup %3246  ;;  %1742 = vmatpush.msrb.mxu1 %v3243_v9  ;;  %1764 = vmatpush.msrb.mxu2 %v3245_v44  ;;  %3258 = vpow2.f32 %v1489_v48  ;;  %v1527_v41 = vmul.f32 1.442695, %v1440_v35  ;;  %v1509_v52 = vmul.f32 1.442695, %v1431_v55  ;;  %v1511_v20 = vmul.f32 1.442695, %v1432_v4 }
 0x1d2   : > { %v3249_v11 = vpop.eup %3248  ;;  %1722 = vmatpush.msrb.mxu0 %v4773_v50  ;;  %3260 = vpow2.f32 %v1523_v38  ;;  %v1493_v39 = vmul.f32 1.442695, %v1423_v16  ;;  %v1495_v8 = vmul.f32 1.442695, %v1424_v0  ;;  %v5515_v48 = vld [vmem:[#allocation59_spill] sm:$0xff]  ;;  %v5517_v38 = vld [vmem:[#allocation64_spill] sm:$0xff]  ;;  %v1895_v19 = vsel %vm1874_vm2, %v4692_v63, %v4816_v6 }
 0x1d3   : > { %v3251_v24 = vpop.eup %3250  ;;  %1743 = vmatpush.msrb.mxu1 %v3233_v23  ;;  %1765 = vmatpush.msrb.mxu2 %v3249_v11  ;;  %3262 = vpow2.f32 %v1559_v2  ;;  %v5510_v23 = vld [vmem:[#allocation19_spill] sm:$0xff]  ;;  %v1880_v1 = vsel %vm1874_vm2, %v5515_v48, %v5514_v31  ;;  %v5518_v44 = vld [vmem:[#allocation54_spill] sm:$0xff]  ;;  %v1896_v3 = vsel %vm1876_vm3, %v4749_v7, %v1895_v19  ;;  %v1898_v0 = vsel %vm1874_vm2, %v4801_v25, %v4820_v26 }
 0x1d4   : > { %v3253_v60 = vpop.eup %3252  ;;  %3264 = vpow2.f32 %v1543_v42  ;;  %1787 = vmatpush.msrb.mxu3 %v3251_v24  ;;  %1723 = vmatpush.msrb.mxu0 %v4795_v53  ;;  %v1875_v33 = vsel %vm1874_vm2, %v5511_v36, %v5510_v23  ;;  %v5520_v42 = vld [vmem:[#allocation10_spill] sm:$0xff]  ;;  %v5522_v11 = vld [vmem:[#allocation55_spill] sm:$0xff] }
 0x1d5   : > { %v3255_v51 = vpop.eup %3254  ;;  %1744 = vmatpush.msrb.mxu1 %v3253_v60  ;;  %1766 = vmatpush.msrb.mxu2 %v3237_v43  ;;  %3266 = vpow2.f32 %v1525_v54  ;;  %v1889_v43 = vsel %vm1874_vm2, %v4605_v29, %v4560_v17  ;;  %v5524_v16 = vld [vmem:[#allocation47_spill] sm:$0xff]  ;;  %v5525_v63 = vld [vmem:[#allocation46_spill] sm:$0xff]  ;;  %v1899_v60 = vsel %vm1876_vm3, %v4761_v47, %v1898_v0 }
 0x1d6   : > { %v3257_v50 = vpop.eup %3256  ;;  %1788 = vmatpush.msrb.mxu3 %v3255_v51  ;;  %1724 = vmatpush.msrb.mxu0 %v4753_v22  ;;  %3268 = vpow2.f32 %v1491_v58  ;;  %v5512_v22 = vld [vmem:[#allocation61_spill] sm:$0xff]  ;;  %v5523_v58 = vld [vmem:[#allocation15_spill] sm:$0xff]  ;;  %v1900_v7 = vsel %vm1878_vm4, %v4799_v61, %v1899_v60 }
 0x1d7   : > { %v3259_v27 = vpop.eup %3258  ;;  %1745 = vmatpush.msrb.mxu1 %v4776_v5  ;;  %1767 = vmatpush.msrb.mxu2 %v3257_v50  ;;  %3270 = vpow2.f32 %v1527_v41  ;;  %v1877_v5 = vsel %vm1876_vm3, %v5512_v22, %v1875_v33  ;;  %v1897_v41 = vsel %vm1878_vm4, %v4780_v45, %v1896_v3  ;;  %v1839_v47 = vld [vmem:[%s5343_s6 + $0x8] sm:$0xff]  ;;  %v1841_v45 = vld [vmem:[%s5343_s6 + $0x18] sm:$0xff] }
 0x1d8   : > { %v3261_v53 = vpop.eup %3260  ;;  %3272 = vpow2.f32 %v1509_v52  ;;  %1789 = vmatpush.msrb.mxu3 %v3247_v15  ;;  %1725 = vmatpush.msrb.mxu0 %v3259_v27  ;;  %v1879_v40 = vsel %vm1878_vm4, %v5513_v46, %v1877_v5  ;;  %v4978_v46 = vld [vmem:[%s5342_s5 + $0x8] sm:$0xff] }
 0x1d9   : > { %v3263_v12 = vpop.eup %3262  ;;  %3274 = vpow2.f32 %v1511_v20  ;;  %1746 = vmatpush.msrb.mxu1 %v3261_v53  ;;  %1768 = vmatpush.msrb.mxu2 %v4782_v59  ;;  %v1890_v59 = vsel %vm1876_vm3, %v4735_v10, %v1889_v43  ;;  %v1892_v10 = vsel %vm1874_vm2, %v4612_v18, %v4576_v34  ;;  %v5519_v34 = vld [vmem:[#allocation63_spill] sm:$0xff] }
 0x1da   : > { %v3265_v57 = vpop.eup %3264  ;;  %1790 = vmatpush.msrb.mxu3 %v3263_v12  ;;  %3004 = vmatmul.msk.f32.vlgmr.msrb.gmra.mxu0 %vm1611_vm1, %v4647_v49  ;;  %3276 = vpow2.f32 %v1493_v39  ;;  %v1891_v17 = vsel %vm1878_vm4, %v4759_v62, %v1890_v59  ;;  %v1893_v62 = vsel %vm1876_vm3, %v4743_v21, %v1892_v10  ;;  %v1883_v18 = vsel %vm1874_vm2, %v5519_v34, %v5518_v44  ;;  %v5521_v21 = vld [vmem:[#allocation11_spill] sm:$0xff]  ;;  %v4969_v12 = vld [vmem:[%s5342_s5] sm:$0xff] }
 0x1db   : > { %v3267_v14 = vpop.eup %3266  ;;  %1747 = vmatpush.msrb.mxu1 %v4769_v13  ;;  %3012 = vmatpush.msk.msra.mxu0 %vm1914_vm5, %v1879_v40  ;;  %3278 = vpow2.f32 %v1495_v8  ;;  %v1881_v13 = vsel %vm1876_vm3, %v5516_v56, %v1880_v1  ;;  %v1894_v2 = vsel %vm1878_vm4, %v4778_v32, %v1893_v62  ;;  %v1884_v15 = vsel %vm1876_vm3, %v5520_v42, %v1883_v18  ;;  %v4989_v1 = vld [vmem:[%s5342_s5 + $0x10] sm:$0xff] }
 0x1dc   : > { %v3269_v37 = vpop.eup %3268  ;;  %1791 = vmatpush.msrb.mxu3 %v3265_v57  ;;  %1769 = vmatpush.msrb.mxu2 %v3267_v14  ;;  %v1882_v9 = vsel %vm1878_vm4, %v5517_v38, %v1881_v13  ;;  %v1885_v54 = vsel %vm1878_vm4, %v5521_v21, %v1884_v15  ;;  %v1886_v32 = vsel %vm1874_vm2, %v5523_v58, %v5522_v11 }
 0x1dd   : > { %v3271_v29 = vpop.eup %3270  ;;  %1748 = vmatpush.msrb.mxu1 %v3269_v37  ;;  %3032 = vmatpush.msk.msrb.mxu0 %vm1914_vm5, %v1891_v17  ;;  %v1887_v24 = vsel %vm1876_vm3, %v5524_v16, %v1886_v32  ;;  %v5002_v17 = vld [vmem:[%s5342_s5 + $0x18] sm:$0xff] }
 0x1de   : > { %v3273_v30 = vpop.eup %3272  ;;  %3006 = vmatmul.msk.f32.vlgmr.msrb.gmra.mxu1 %vm1611_vm1, %v4647_v49  ;;  %1792 = vmatpush.msrb.mxu3 %v3271_v29  ;;  %v1888_v6 = vsel %vm1878_vm4, %v5525_v63, %v1887_v24 }
 0x1df   : > { %v3275_v35 = vpop.eup %3274  ;;  %3017 = vmatpush.msk.msra.mxu1 %vm1914_vm5, %v1882_v9  ;;  %1770 = vmatpush.msrb.mxu2 %v3273_v30 }
 0x1e0   : > { %v3277_v55 = vpop.eup %3276  ;;  %1793 = vmatpush.msrb.mxu3 %v3275_v35 }
 0x1e1   : > { %3037 = vmatpush.msk.msrb.mxu1 %vm1914_vm5, %v1894_v2  ;;  %v3279_v4 = vpop.eup %3278  ;;  %1771 = vmatpush.msrb.mxu2 %v3277_v55 }
 0x1e2   : > { %1794 = vmatpush.msrb.mxu3 %v3279_v4  ;;  %3008 = vmatmul.msk.f32.vlgmr.msrb.gmra.mxu2 %vm1611_vm1, %v4647_v49 }
 0x1e3   : > { %3010 = vmatmul.msk.f32.vlgmr.msrb.gmra.mxu3 %vm1611_vm1, %v4647_v49  ;;  %3022 = vmatpush.msk.msra.mxu2 %vm1914_vm5, %v1885_v54  ;;  %v1838_v49 = vld [vmem:[%s5343_s6] sm:$0xff] }
 0x1e4   : > { %3027 = vmatpush.msk.msra.mxu3 %vm1914_vm5, %v1888_v6  ;;  %3005 = vmatmul.msk.f32.gmra.mxu0 %vm1611_vm1, %v4701_v28 }
 0x1e5   : > { %3042 = vmatpush.msk.msrb.mxu2 %vm1914_vm5, %v1897_v41 }
 0x1e6   : > { %3047 = vmatpush.msk.msrb.mxu3 %vm1914_vm5, %v1900_v7  ;;  %3007 = vmatmul.msk.f32.gmra.mxu1 %vm1611_vm1, %v4701_v28 }
 0x1ea   : > { %3009 = vmatmul.msk.f32.gmra.mxu2 %vm1611_vm1, %v4701_v28 }
 0x1eb   : > { %3011 = vmatmul.msk.f32.gmra.mxu3 %vm1611_vm1, %v4701_v28  ;;  %v1840_v28 = vld [vmem:[%s5343_s6 + $0x10] sm:$0xff] }
 0x1ec   : > { %3013 = vmatmul.msk.f32.vlgmr.msra.gmra.mxu0 %vm1901_vm6, %v1838_v49 }
 0x1ee   : > { %3018 = vmatmul.msk.f32.vlgmr.msra.gmra.mxu1 %vm1901_vm6, %v1838_v49 }
 0x1f2   : > { %3023 = vmatmul.msk.f32.vlgmr.msra.gmra.mxu2 %vm1901_vm6, %v1838_v49 }
 0x1f3   : > { %3028 = vmatmul.msk.f32.vlgmr.msra.gmra.mxu3 %vm1901_vm6, %v1838_v49 }
 0x1f4   : > { %3014 = vmatmul.msk.f32.gmra.mxu0 %vm1901_vm6, %v1839_v47 }
 0x1f6   : > { %3019 = vmatmul.msk.f32.gmra.mxu1 %vm1901_vm6, %v1839_v47 }
 0x1fa   : > { %3024 = vmatmul.msk.f32.gmra.mxu2 %vm1901_vm6, %v1839_v47 }
 0x1fb   : > { %3029 = vmatmul.msk.f32.gmra.mxu3 %vm1901_vm6, %v1839_v47 }
 0x1fc   : > { %3015 = vmatmul.msk.f32.gmra.mxu0 %vm1901_vm6, %v1840_v28 }
 0x1fe   : > { %3020 = vmatmul.msk.f32.gmra.mxu1 %vm1901_vm6, %v1840_v28 }
 0x202   : > { %3025 = vmatmul.msk.f32.gmra.mxu2 %vm1901_vm6, %v1840_v28 }
 0x203   : > { %3030 = vmatmul.msk.f32.gmra.mxu3 %vm1901_vm6, %v1840_v28 }
 0x204   : > { %3016 = vmatmul.msk.f32.gmra.mxu0 %vm1901_vm6, %v1841_v45 }
 0x206   : > { %3021 = vmatmul.msk.f32.gmra.mxu1 %vm1901_vm6, %v1841_v45 }
 0x20a   : > { %3026 = vmatmul.msk.f32.gmra.mxu2 %vm1901_vm6, %v1841_v45 }
 0x20b   : > { %3031 = vmatmul.msk.f32.gmra.mxu3 %vm1901_vm6, %v1841_v45 }
 0x20c   : > { %3033 = vmatmul.msk.f32.vlgmr.msrb.gmra.mxu0 %vm1901_vm6, %v1838_v49 }
 0x20e   : > { %3038 = vmatmul.msk.f32.vlgmr.msrb.gmra.mxu1 %vm1901_vm6, %v1838_v49 }
 0x212   : > { %3043 = vmatmul.msk.f32.vlgmr.msrb.gmra.mxu2 %vm1901_vm6, %v1838_v49 }
 0x213   : > { %3048 = vmatmul.msk.f32.vlgmr.msrb.gmra.mxu3 %vm1901_vm6, %v1838_v49 }
 0x214   : > { %3034 = vmatmul.msk.f32.gmra.mxu0 %vm1901_vm6, %v1839_v47 }
 0x216   : > { %3039 = vmatmul.msk.f32.gmra.mxu1 %vm1901_vm6, %v1839_v47 }
 0x21a   : > { %3044 = vmatmul.msk.f32.gmra.mxu2 %vm1901_vm6, %v1839_v47 }
 0x21b   : > { %3049 = vmatmul.msk.f32.gmra.mxu3 %vm1901_vm6, %v1839_v47 }
 0x21c   : > { %3035 = vmatmul.msk.f32.gmra.mxu0 %vm1901_vm6, %v1840_v28 }
 0x21e   : > { %3040 = vmatmul.msk.f32.gmra.mxu1 %vm1901_vm6, %v1840_v28 }
 0x222   : > { %3045 = vmatmul.msk.f32.gmra.mxu2 %vm1901_vm6, %v1840_v28 }
 0x223   : > { %3050 = vmatmul.msk.f32.gmra.mxu3 %vm1901_vm6, %v1840_v28 }
 0x224   : > { %3036 = vmatmul.msk.f32.gmra.mxu0 %vm1901_vm6, %v1841_v45 }
 0x226   : > { %3041 = vmatmul.msk.f32.gmra.mxu1 %vm1901_vm6, %v1841_v45 }
 0x229   : > { %v1635_v61 = vpop.f32.mrf.mxu0 }
 0x22a   : > { %3046 = vmatmul.msk.f32.gmra.mxu2 %vm1901_vm6, %v1841_v45  ;;  %3280 = vlog2.f32 %v1635_v61 }
 0x22b   : > { %v1658_v25 = vpop.f32.mrf.mxu1  ;;  %3051 = vmatmul.msk.f32.gmra.mxu3 %vm1901_vm6, %v1841_v45 }
 0x22c   : > { %3282 = vlog2.f32 %v1658_v25 }
 0x230   : > { %v3281_v51 = vpop.eup %3280 }
 0x231   : > { %v1638_v26 = vpop.f32.mrf.mxu0  ;;  %v1807_v8 = vmul.f32 0.6931472, %v3281_v51 }
 0x232   : > { %3284 = vlog2.f32 %v1638_v26  ;;  %v3283_v50 = vpop.eup %3282 }
 0x233   : > { %v1661_v52 = vpop.f32.mrf.mxu1  ;;  %v1809_v36 = vmul.f32 0.6931472, %v3283_v50 }
 0x234   : > { %3286 = vlog2.f32 %v1661_v52 }
 0x235   : > { %v1681_v20 = vpop.f32.mrf.mxu2 }
 0x236   : > { %v1704_v39 = vpop.f32.mrf.mxu3  ;;  %3288 = vlog2.f32 %v1681_v20 }
 0x237   : > { %3290 = vlog2.f32 %v1704_v39 }
 0x238   : > { %v3285_v27 = vpop.eup %3284 }
 0x239   : > { %v1823_v53 = vmul.f32 0.6931472, %v3285_v27 }
 0x23a   : > { %v3287_v23 = vpop.eup %3286 }
 0x23b   : > { %v1825_v33 = vmul.f32 0.6931472, %v3287_v23  ;;  %2189 = vmatpush.msra.mxu0 %v1823_v53 }
 0x23c   : > { %v3289_v57 = vpop.eup %3288 }
 0x23d   : > { %2218 = vmatpush.msra.mxu1 %v1825_v33  ;;  %2190 = vmatpush.msra.mxu0 %v1807_v8  ;;  %v1684_v22 = vpop.f32.mrf.mxu2  ;;  %v3291_v40 = vpop.eup %3290  ;;  %v1811_v59 = vmul.f32 0.6931472, %v3289_v57 }
 0x23e   : > { %3052 = vmatmul.msk.f32.vlgmr.msra.gmra.mxu0 %vm376_vm0, %v4969_v12  ;;  %3292 = vlog2.f32 %v1684_v22  ;;  %v1707_v5 = vpop.f32.mrf.mxu3  ;;  %v1813_v31 = vmul.f32 0.6931472, %v3291_v40 }
 0x23f   : > { %2219 = vmatpush.msra.mxu1 %v1809_v36  ;;  %3294 = vlog2.f32 %v1707_v5 }
 0x240   : > { %3056 = vmatmul.msk.f32.vlgmr.msra.gmra.mxu1 %vm376_vm0, %v4969_v12 }
 0x244   : > { %v3293_v43 = vpop.eup %3292 }
 0x245   : > { %v3295_v14 = vpop.eup %3294  ;;  %v1827_v37 = vmul.f32 0.6931472, %v3293_v43 }
 0x246   : > { %3053 = vmatmul.msk.f32.gmra.mxu0 %vm376_vm0, %v4978_v46  ;;  %v1829_v48 = vmul.f32 0.6931472, %v3295_v14 }
 0x247   : > { %2247 = vmatpush.msra.mxu2 %v1827_v37 }
 0x248   : > { %3057 = vmatmul.msk.f32.gmra.mxu1 %vm376_vm0, %v4978_v46  ;;  %2276 = vmatpush.msra.mxu3 %v1829_v48 }
 0x249   : > { %2248 = vmatpush.msra.mxu2 %v1811_v59 }
 0x24a   : > { %2277 = vmatpush.msra.mxu3 %v1813_v31  ;;  %3060 = vmatmul.msk.f32.vlgmr.msra.gmra.mxu2 %vm376_vm0, %v4969_v12 }
 0x24b   : > { %3064 = vmatmul.msk.f32.vlgmr.msra.gmra.mxu3 %vm376_vm0, %v4969_v12 }
 0x24e   : > { %3054 = vmatmul.msk.f32.gmra.mxu0 %vm376_vm0, %v4989_v1 }
 0x250   : > { %3058 = vmatmul.msk.f32.gmra.mxu1 %vm376_vm0, %v4989_v1 }
 0x252   : > { %3061 = vmatmul.msk.f32.gmra.mxu2 %vm376_vm0, %v4978_v46 }
 0x253   : > { %3065 = vmatmul.msk.f32.gmra.mxu3 %vm376_vm0, %v4978_v46 }
 0x256   : > { %3055 = vmatmul.msk.f32.gmra.mxu0 %vm376_vm0, %v5002_v17 }
 0x257   : > { %v1727_v29 = vpop.f32.mrf.mxu0 }
 0x258   : > { %3059 = vmatmul.msk.f32.gmra.mxu1 %vm376_vm0, %v5002_v17  ;;  %3296 = vlog2.f32 %v1727_v29 }
 0x25a   : > { %3062 = vmatmul.msk.f32.gmra.mxu2 %vm376_vm0, %v4989_v1 }
 0x25b   : > { %v1750_v56 = vpop.f32.mrf.mxu1  ;;  %3066 = vmatmul.msk.f32.gmra.mxu3 %vm376_vm0, %v4989_v1 }
 0x25c   : > { %3298 = vlog2.f32 %v1750_v56 }
 0x25e   : > { %v3297_v9 = vpop.eup %3296 }
 0x25f   : > { %v1815_v44 = vmul.f32 0.6931472, %v3297_v9 }
 0x261   : > { %v1730_v13 = vpop.f32.mrf.mxu0 }
 0x262   : > { %3063 = vmatmul.msk.f32.gmra.mxu2 %vm376_vm0, %v5002_v17  ;;  %3300 = vlog2.f32 %v1730_v13  ;;  %v3299_v62 = vpop.eup %3298 }
 0x263   : > { %v1753_v10 = vpop.f32.mrf.mxu1  ;;  %3067 = vmatmul.msk.f32.gmra.mxu3 %vm376_vm0, %v5002_v17  ;;  %v1817_v18 = vmul.f32 0.6931472, %v3299_v62 }
 0x264   : > { %3302 = vlog2.f32 %v1753_v10 }
 0x265   : > { %v1773_v30 = vpop.f32.mrf.mxu2 }
 0x266   : > { %v1796_v38 = vpop.f32.mrf.mxu3  ;;  %3304 = vlog2.f32 %v1773_v30 }
 0x267   : > { %3306 = vlog2.f32 %v1796_v38 }
 0x268   : > { %v3301_v35 = vpop.eup %3300 }
 0x269   : > { %v1831_v34 = vmul.f32 0.6931472, %v3301_v35  ;;  %v5018_v42 = vpop.f32.mrf.mxu0 }
 0x26a   : > { %v3303_v2 = vpop.eup %3302 }
 0x26b   : > { %v1833_v55 = vmul.f32 0.6931472, %v3303_v2  ;;  %2305 = vmatpush.msrb.mxu0 %v1831_v34  ;;  %v5020_v15 = vpop.f32.mrf.mxu1 }
 0x26c   : > { %v3305_v54 = vpop.eup %3304 }
 0x26d   : > { %2334 = vmatpush.msrb.mxu1 %v1833_v55  ;;  %v1776_v4 = vpop.f32.mrf.mxu2  ;;  %2306 = vmatpush.msrb.mxu0 %v1815_v44  ;;  %v3307_v11 = vpop.eup %3306  ;;  %v1819_v3 = vmul.f32 0.6931472, %v3305_v54 }
 0x26e   : > { %3308 = vlog2.f32 %v1776_v4  ;;  %v1799_v21 = vpop.f32.mrf.mxu3  ;;  %3068 = vmatmul.msk.f32.vlgmr.msrb.gmra.mxu0 %vm376_vm0, %v4969_v12  ;;  %v1821_v63 = vmul.f32 0.6931472, %v3307_v11 }
 0x26f   : > { %3310 = vlog2.f32 %v1799_v21  ;;  %2335 = vmatpush.msrb.mxu1 %v1817_v18 }
 0x270   : > { %3072 = vmatmul.msk.f32.vlgmr.msrb.gmra.mxu1 %vm376_vm0, %v4969_v12 }
 0x271   : > { %v1951_v16 = vpop.f32.mrf.mxu0 }
 0x273   : > { %v1980_v0 = vpop.f32.mrf.mxu1 }
 0x274   : > { %v3309_v58 = vpop.eup %3308 }
 0x275   : > { %v3311_v32 = vpop.eup %3310  ;;  %v1835_v19 = vmul.f32 0.6931472, %v3309_v58  ;;  %v5034_v6 = vpop.f32.mrf.mxu2 }
 0x276   : > { %v1837_v24 = vmul.f32 0.6931472, %v3311_v32  ;;  %3069 = vmatmul.msk.f32.gmra.mxu0 %vm376_vm0, %v4978_v46  ;;  %v5036_v60 = vpop.f32.mrf.mxu3 }
 0x277   : > { %2363 = vmatpush.msrb.mxu2 %v1835_v19 }
 0x278   : > { %3073 = vmatmul.msk.f32.gmra.mxu1 %vm376_vm0, %v4978_v46  ;;  %2392 = vmatpush.msrb.mxu3 %v1837_v24 }
 0x279   : > { %2364 = vmatpush.msrb.mxu2 %v1819_v3  ;;  %v1954_v41 = vpop.f32.mrf.mxu0 }
 0x27a   : > { %2393 = vmatpush.msrb.mxu3 %v1821_v63  ;;  %3076 = vmatmul.msk.f32.vlgmr.msrb.gmra.mxu2 %vm376_vm0, %v4969_v12 }
 0x27b   : > { %3080 = vmatmul.msk.f32.vlgmr.msrb.gmra.mxu3 %vm376_vm0, %v4969_v12  ;;  %v1983_v7 = vpop.f32.mrf.mxu1 }
 0x27d   : > { %v5048_v49 = vpop.f32.mrf.mxu2 }
 0x27e   : > { %3070 = vmatmul.msk.f32.gmra.mxu0 %vm376_vm0, %v4989_v1  ;;  %v5052_v28 = vpop.f32.mrf.mxu3 }
 0x280   : > { %3074 = vmatmul.msk.f32.gmra.mxu1 %vm376_vm0, %v4989_v1 }
 0x281   : > { %v1957_v47 = vpop.f32.mrf.mxu0 }
 0x282   : > { %3077 = vmatmul.msk.f32.gmra.mxu2 %vm376_vm0, %v4978_v46 }
 0x283   : > { %3081 = vmatmul.msk.f32.gmra.mxu3 %vm376_vm0, %v4978_v46  ;;  %v1986_v45 = vpop.f32.mrf.mxu1 }
 0x285   : > { %v2012_v61 = vpop.f32.mrf.mxu2 }
 0x286   : > { %3071 = vmatmul.msk.f32.gmra.mxu0 %vm376_vm0, %v5002_v17  ;;  %v5062_v26 = vpop.f32.mrf.mxu3 }
 0x288   : > { %3075 = vmatmul.msk.f32.gmra.mxu1 %vm376_vm0, %v5002_v17 }
 0x289   : > { %v5060_v25 = vpop.f32.mrf.mxu0 }
 0x28a   : > { %3078 = vmatmul.msk.f32.gmra.mxu2 %vm376_vm0, %v4989_v1 }
 0x28b   : > { %3082 = vmatmul.msk.f32.gmra.mxu3 %vm376_vm0, %v4989_v1  ;;  %v5066_v52 = vpop.f32.mrf.mxu1 }
 0x28d   : > { %v5068_v51 = vpop.f32.mrf.mxu2 }
 0x28e   : > { %v5072_v50 = vpop.f32.mrf.mxu3 }
 0x291   : > { %v5070_v20 = vpop.f32.mrf.mxu0 }
 0x292   : > { %3079 = vmatmul.msk.f32.gmra.mxu2 %vm376_vm0, %v5002_v17 }
 0x293   : > { %3083 = vmatmul.msk.f32.gmra.mxu3 %vm376_vm0, %v5002_v17  ;;  %v5074_v39 = vpop.f32.mrf.mxu1 }
 0x295   : > { %v5076_v27 = vpop.f32.mrf.mxu2 }
 0x296   : > { %v5080_v53 = vpop.f32.mrf.mxu3 }
 0x299   : > { %v5078_v8 = vpop.f32.mrf.mxu0 }
 0x29b   : > { %v5082_v23 = vpop.f32.mrf.mxu1 }
 0x29d   : > { %v5084_v36 = vpop.f32.mrf.mxu2 }
 0x29e   : > { %v5088_v12 = vpop.f32.mrf.mxu3 }
 0x2a1   : > { %v5086_v33 = vpop.f32.mrf.mxu0 }
 0x2a3   : > { %v5090_v22 = vpop.f32.mrf.mxu1 }
 0x2a5   : > { %v5092_v5 = vpop.f32.mrf.mxu2 }
 0x2a6   : > { %v5094_v46 = vpop.f32.mrf.mxu3 }
 0x2ad   : > { %v5096_v14 = vpop.f32.mrf.mxu2 }
 0x2ae   : > { %v5098_v37 = vpop.f32.mrf.mxu3 }
 0x2bb   : > { %v2192_v57 = vpop.f32.mrf.mxu0 }
 0x2bc   : > { %v5101_v56 = vadd.f32 %v2192_v57, %v5018_v42 }
 0x2bd   : > { %v2221_v40 = vpop.f32.mrf.mxu1 }
 0x2be   : > { %v5104_v30 = vadd.f32 %v2221_v40, %v5020_v15 }
 0x2c3   : > { %v2195_v43 = vpop.f32.mrf.mxu0 }
 0x2c4   : > { %v2196_v1 = vadd.f32 %v2195_v43, %v1951_v16 }
 0x2c5   : > { %v2224_v59 = vpop.f32.mrf.mxu1 }
 0x2c6   : > { %v2225_v13 = vadd.f32 %v2224_v59, %v1980_v0  ;;  %v2407_v38 = vmax.f32 %v5101_v56, %v2196_v1 }
 0x2c8   : > { %v2416_v35 = vmax.f32 %v5104_v30, %v2225_v13 }
 0x2cb   : > { %v2198_v31 = vpop.f32.mrf.mxu0 }
 0x2cc   : > { %v2199_v10 = vadd.f32 %v2198_v31, %v1954_v41 }
 0x2cd   : > { %v2227_v48 = vpop.f32.mrf.mxu1  ;;  %v2250_v17 = vpop.f32.mrf.mxu2 }
 0x2ce   : > { %v2279_v29 = vpop.f32.mrf.mxu3  ;;  %v2228_v9 = vadd.f32 %v2227_v48, %v1983_v7  ;;  %v2408_v2 = vmax.f32 %v2407_v38, %v2199_v10 }
 0x2cf   : > { %v5122_v59 = vadd.f32 %v2279_v29, %v5036_v60 }
 0x2d0   : > { %v2417_v18 = vmax.f32 %v2416_v35, %v2228_v9 }
 0x2d3   : > { %v2201_v62 = vpop.f32.mrf.mxu0 }
 0x2d4   : > { %v2202_v44 = vadd.f32 %v2201_v62, %v1957_v47  ;;  %v5112_v47 = vadd.f32 %v2250_v17, %v5034_v6 }
 0x2d5   : > { %v2230_v34 = vpop.f32.mrf.mxu1  ;;  %v2253_v21 = vpop.f32.mrf.mxu2 }
 0x2d6   : > { %v2409_v55 = vmax.f32 %v2408_v2, %v2202_v44  ;;  %v2231_v4 = vadd.f32 %v2230_v34, %v1986_v45  ;;  %v2282_v42 = vpop.f32.mrf.mxu3  ;;  %v5109_v0 = vadd.f32 %v2253_v21, %v5048_v49 }
 0x2d7   : > { %v5115_v45 = vadd.f32 %v2282_v42, %v5052_v28 }
 0x2d8   : > { %v2410_v54 = vrot.slane %v2409_v55, 4  ;;  %v2418_v11 = vmax.f32 %v2417_v18, %v2231_v4  ;;  %v2425_v49 = vmax.f32 %v5112_v47, %v5109_v0 }
 0x2d9   : > { %v2434_v17 = vmax.f32 %v5122_v59, %v5115_v45 }
 0x2da   : > { %v2411_v58 = vmax.f32 %v2409_v55, %v2410_v54  ;;  %v2419_v32 = vrot.slane %v2418_v11, 4 }
 0x2dc   : > { %v2412_v15 = vrot.slane %v2411_v58, 2  ;;  %v2420_v19 = vmax.f32 %v2418_v11, %v2419_v32 }
 0x2dd   : > { %v2256_v3 = vpop.f32.mrf.mxu2 }
 0x2de   : > { %v2413_v16 = vmax.f32 %v2411_v58, %v2412_v15  ;;  %v2421_v24 = vrot.slane %v2420_v19, 2  ;;  %v2285_v63 = vpop.f32.mrf.mxu3  ;;  %v5117_v57 = vadd.f32 %v2256_v3, %v2012_v61 }
 0x2df   : > { %v5127_v31 = vadd.f32 %v2285_v63, %v5062_v26 }
 0x2e0   : > { %v2414_v41 = vrot.slane %v2413_v16, 1  ;;  %v2422_v7 = vmax.f32 %v2420_v19, %v2421_v24  ;;  %v2426_v60 = vmax.f32 %v2425_v49, %v5117_v57 }
 0x2e2   : > { %v5119_v40 = vmax.f32 %v2413_v16, %v2414_v41  ;;  %v2423_v43 = vrot.slane %v2422_v7, 1 }
 0x2e4   : > { %v2503_v6 = vsub.f32 %v2202_v44, %v5119_v40  ;;  %v5130_v48 = vmax.f32 %v2422_v7, %v2423_v43  ;;  %v2495_v28 = vsub.f32 %v2199_v10, %v5119_v40  ;;  %v2487_v61 = vsub.f32 %v2196_v1, %v5119_v40 }
 0x2e5   : > { %v2479_v29 = vsub.f32 %v5101_v56, %v5119_v40  ;;  %v2259_v62 = vpop.f32.mrf.mxu2  ;;  %v2435_v44 = vmax.f32 %v2434_v17, %v5127_v31 }
 0x2e6   : > { %v2559_v38 = vmul.f32 1.442695, %v2503_v6  ;;  %v2504_v26 = vsub.f32 %v2231_v4, %v5130_v48  ;;  %v2543_v35 = vmul.f32 1.442695, %v2495_v28  ;;  %v2496_v2 = vsub.f32 %v2228_v9, %v5130_v48  ;;  %v2288_v1 = vpop.f32.mrf.mxu3 }
 0x2e7   : > { %v5143_v10 = vadd.f32 %v2259_v62, %v5068_v51  ;;  %v2527_v34 = vmul.f32 1.442695, %v2487_v61  ;;  %v2488_v18 = vsub.f32 %v2225_v13, %v5130_v48  ;;  %v2289_v56 = vadd.f32 %v2288_v1, %v5072_v50  ;;  %v5157_v61 = vld [vmem:[%s5344_s7] sm:$0xff] }
 0x2e8   : > { %3312 = vpow2.f32 %v2559_v38  ;;  %v2561_v55 = vmul.f32 1.442695, %v2504_v26  ;;  %v2545_v21 = vmul.f32 1.442695, %v2496_v2  ;;  %v2480_v9 = vsub.f32 %v5104_v30, %v5130_v48 }
 0x2e9   : > { %v2427_v4 = vmax.f32 %v2426_v60, %v5143_v10  ;;  %3314 = vpow2.f32 %v2543_v35  ;;  %v2529_v42 = vmul.f32 1.442695, %v2488_v18  ;;  %v2436_v54 = vmax.f32 %v2435_v44, %v2289_v56 }
 0x2ea   : > { %3316 = vpow2.f32 %v2561_v55  ;;  %v2511_v51 = vmul.f32 1.442695, %v2479_v29  ;;  %v2513_v13 = vmul.f32 1.442695, %v2480_v9 }
 0x2eb   : > { %v2428_v11 = vrot.slane %v2427_v4, 4  ;;  %3318 = vpow2.f32 %v2545_v21  ;;  %v2437_v58 = vrot.slane %v2436_v54, 4  ;;  %v5150_v32 = vpop.f32.mrf.mxu0 }
 0x2ec   : > { %3320 = vpow2.f32 %v2527_v34 }
 0x2ed   : > { %v2429_v15 = vmax.f32 %v2427_v4, %v2428_v11  ;;  %3322 = vpow2.f32 %v2529_v42  ;;  %v5152_v50 = vpop.f32.mrf.mxu1  ;;  %v2438_v16 = vmax.f32 %v2436_v54, %v2437_v58 }
 0x2ee   : > { %v3313_v19 = vpop.eup %3312  ;;  %3324 = vpow2.f32 %v2511_v51 }
 0x2ef   : > { %v3315_v24 = vpop.eup %3314  ;;  %v2430_v3 = vrot.slane %v2429_v15, 2  ;;  %2592 = vmatpush.msra.mxu0 %v3313_v19  ;;  %v2439_v63 = vrot.slane %v2438_v16, 2  ;;  %3326 = vpow2.f32 %v2513_v13 }
 0x2f0   : > { %v3317_v30 = vpop.eup %3316 }
 0x2f1   : > { %v3319_v41 = vpop.eup %3318  ;;  %v2431_v7 = vmax.f32 %v2429_v15, %v2430_v3  ;;  %2612 = vmatpush.msra.mxu1 %v3317_v30  ;;  %2593 = vmatpush.msra.mxu0 %v3315_v24  ;;  %v2440_v49 = vmax.f32 %v2438_v16, %v2439_v63  ;;  %v5190_v15 = vadd.f32 %v5150_v32, %v5060_v25 }
 0x2f2   : > { %v3321_v43 = vpop.eup %3320  ;;  %v5197_v24 = vadd.f32 %v5152_v50, %v5066_v52 }
 0x2f3   : > { %v3323_v6 = vpop.eup %3322  ;;  %v2432_v28 = vrot.slane %v2431_v7, 1  ;;  %2613 = vmatpush.msra.mxu1 %v3319_v41  ;;  %2594 = vmatpush.msra.mxu0 %v3321_v43  ;;  %v2441_v60 = vrot.slane %v2440_v49, 1  ;;  %v2311_v29 = vpop.f32.mrf.mxu0 }
 0x2f4   : > { %v3325_v17 = vpop.eup %3324  ;;  %v5183_v13 = vadd.f32 %v2311_v29, %v5070_v20 }
 0x2f5   : > { %v5159_v38 = vmax.f32 %v2431_v7, %v2432_v28  ;;  %2614 = vmatpush.msra.mxu1 %v3323_v6  ;;  %2595 = vmatpush.msra.mxu0 %v3325_v17  ;;  %v2340_v26 = vpop.f32.mrf.mxu1  ;;  %v3327_v62 = vpop.eup %3326  ;;  %v5161_v35 = vmax.f32 %v2440_v49, %v2441_v60 }
 0x2f6   : > { %3084 = vmatmul.msk.f32.vlgmr.msra.gmra.mxu0 %vm2576_vm7, %v5157_v61  ;;  %v2443_v25 = vmax.f32 %v5190_v15, %v5183_v13 }
 0x2f7   : > { %v2505_v2 = vsub.f32 %v5143_v10, %v5159_v38  ;;  %2615 = vmatpush.msra.mxu1 %v3327_v62  ;;  %v2497_v44 = vsub.f32 %v5117_v57, %v5159_v38  ;;  %v2489_v1 = vsub.f32 %v5109_v0, %v5159_v38  ;;  %v2506_v34 = vsub.f32 %v2289_v56, %v5161_v35 }
 0x2f8   : > { %3085 = vmatmul.msk.f32.vlgmr.msra.gmra.mxu1 %vm2576_vm7, %v5157_v61  ;;  %v2498_v18 = vsub.f32 %v5127_v31, %v5161_v35  ;;  %v2490_v55 = vsub.f32 %v5115_v45, %v5161_v35  ;;  %v2481_v4 = vsub.f32 %v5112_v47, %v5159_v38  ;;  %v2482_v0 = vsub.f32 %v5122_v59, %v5161_v35 }
 0x2f9   : > { %v2563_v21 = vmul.f32 1.442695, %v2505_v2  ;;  %v2547_v10 = vmul.f32 1.442695, %v2497_v44  ;;  %v2565_v57 = vmul.f32 1.442695, %v2506_v34  ;;  %v5186_v47 = vadd.f32 %v2340_v26, %v5074_v39 }
 0x2fa   : > { %v2549_v42 = vmul.f32 1.442695, %v2498_v18  ;;  %v2531_v56 = vmul.f32 1.442695, %v2489_v1  ;;  %v2533_v9 = vmul.f32 1.442695, %v2490_v55 }
 0x2fb   : > { %3328 = vpow2.f32 %v2563_v21  ;;  %v2314_v54 = vpop.f32.mrf.mxu0  ;;  %v2515_v31 = vmul.f32 1.442695, %v2481_v4  ;;  %v2517_v45 = vmul.f32 1.442695, %v2482_v0 }
 0x2fc   : > { %3330 = vpow2.f32 %v2565_v57  ;;  %v5193_v19 = vadd.f32 %v2314_v54, %v5078_v8  ;;  %v2452_v8 = vmax.f32 %v5197_v24, %v5186_v47 }
 0x2fd   : > { %3332 = vpow2.f32 %v2547_v10  ;;  %v2343_v51 = vpop.f32.mrf.mxu1  ;;  %v2366_v11 = vpop.f32.mrf.mxu2 }
 0x2fe   : > { %3334 = vpow2.f32 %v2549_v42  ;;  %v2395_v58 = vpop.f32.mrf.mxu3  ;;  %v5200_v20 = vadd.f32 %v2343_v51, %v5082_v23  ;;  %v2444_v52 = vmax.f32 %v2443_v25, %v5193_v19  ;;  %v5221_v21 = vadd.f32 %v2366_v11, %v5076_v27 }
 0x2ff   : > { %3336 = vpow2.f32 %v2531_v56  ;;  %v5227_v57 = vadd.f32 %v2395_v58, %v5080_v53 }
 0x300   : > { %3338 = vpow2.f32 %v2533_v9  ;;  %v2453_v7 = vmax.f32 %v2452_v8, %v5200_v20 }
 0x301   : > { %v3329_v59 = vpop.eup %3328  ;;  %3340 = vpow2.f32 %v2515_v31 }
 0x302   : > { %v3331_v16 = vpop.eup %3330  ;;  %2632 = vmatpush.msra.mxu2 %v3329_v59  ;;  %3342 = vpow2.f32 %v2517_v45 }
 0x303   : > { %v3333_v39 = vpop.eup %3332  ;;  %2652 = vmatpush.msra.mxu3 %v3331_v16  ;;  %v2317_v3 = vpop.f32.mrf.mxu0 }
 0x304   : > { %v3335_v32 = vpop.eup %3334  ;;  %2633 = vmatpush.msra.mxu2 %v3333_v39  ;;  %v2318_v50 = vadd.f32 %v2317_v3, %v5086_v33 }
 0x305   : > { %v3337_v30 = vpop.eup %3336  ;;  %2653 = vmatpush.msra.mxu3 %v3335_v32  ;;  %v2346_v63 = vpop.f32.mrf.mxu1 }
 0x306   : > { %v2369_v23 = vpop.f32.mrf.mxu2  ;;  %v3339_v41 = vpop.eup %3338  ;;  %2634 = vmatpush.msra.mxu2 %v3337_v30  ;;  %v2347_v43 = vadd.f32 %v2346_v63, %v5090_v22  ;;  %v2445_v28 = vmax.f32 %v2444_v52, %v2318_v50 }
 0x307   : > { %v2398_v49 = vpop.f32.mrf.mxu3  ;;  %v3341_v6 = vpop.eup %3340  ;;  %2654 = vmatpush.msra.mxu3 %v3339_v41  ;;  %v5215_v1 = vadd.f32 %v2369_v23, %v5084_v36 }
 0x308   : > { %v3343_v17 = vpop.eup %3342  ;;  %2635 = vmatpush.msra.mxu2 %v3341_v6  ;;  %v2454_v60 = vmax.f32 %v2453_v7, %v2347_v43  ;;  %v2446_v33 = vrot.slane %v2445_v28, 4  ;;  %v5218_v55 = vadd.f32 %v2398_v49, %v5088_v12 }
 0x309   : > { %2655 = vmatpush.msra.mxu3 %v3343_v17  ;;  %3086 = vmatmul.msk.f32.vlgmr.msra.gmra.mxu2 %vm2576_vm7, %v5157_v61  ;;  %v2461_v56 = vmax.f32 %v5221_v21, %v5215_v1 }
 0x30a   : > { %3087 = vmatmul.msk.f32.vlgmr.msra.gmra.mxu3 %vm2576_vm7, %v5157_v61  ;;  %v2455_v29 = vrot.slane %v2454_v60, 4  ;;  %v2447_v26 = vmax.f32 %v2445_v28, %v2446_v33  ;;  %v2470_v27 = vmax.f32 %v5227_v57, %v5218_v55 }
 0x30c   : > { %v2456_v62 = vmax.f32 %v2454_v60, %v2455_v29  ;;  %v2448_v2 = vrot.slane %v2447_v26, 2 }
 0x30e   : > { %v2372_v22 = vpop.f32.mrf.mxu2  ;;  %v2457_v44 = vrot.slane %v2456_v62, 2  ;;  %v2449_v18 = vmax.f32 %v2447_v26, %v2448_v2 }
 0x30f   : > { %v2401_v34 = vpop.f32.mrf.mxu3  ;;  %v5224_v4 = vadd.f32 %v2372_v22, %v5092_v5 }
 0x310   : > { %v2458_v10 = vmax.f32 %v2456_v62, %v2457_v44  ;;  %v2450_v42 = vrot.slane %v2449_v18, 1  ;;  %v5230_v0 = vadd.f32 %v2401_v34, %v5094_v46 }
 0x311   : > { %v2462_v5 = vmax.f32 %v2461_v56, %v5224_v4 }
 0x312   : > { %v2459_v36 = vrot.slane %v2458_v10, 1  ;;  %v5234_v12 = vmax.f32 %v2449_v18, %v2450_v42  ;;  %v2471_v54 = vmax.f32 %v2470_v27, %v5230_v0 }
 0x314   : > { %v5238_v9 = vmax.f32 %v2458_v10, %v2459_v36  ;;  %v2507_v53 = vsub.f32 %v2318_v50, %v5234_v12  ;;  %v2499_v46 = vsub.f32 %v5193_v19, %v5234_v12  ;;  %v2491_v51 = vsub.f32 %v5183_v13, %v5234_v12 }
 0x315   : > { %v2483_v19 = vsub.f32 %v5190_v15, %v5234_v12 }
 0x316   : > { %v2375_v31 = vpop.f32.mrf.mxu2  ;;  %v2508_v11 = vsub.f32 %v2347_v43, %v5238_v9  ;;  %v2500_v59 = vsub.f32 %v5200_v20, %v5238_v9  ;;  %v2492_v16 = vsub.f32 %v5186_v47, %v5238_v9  ;;  %v2567_v39 = vmul.f32 1.442695, %v2507_v53 }
 0x317   : > { %v2376_v45 = vadd.f32 %v2375_v31, %v5096_v14  ;;  %v2404_v58 = vpop.f32.mrf.mxu3  ;;  %v2551_v32 = vmul.f32 1.442695, %v2499_v46  ;;  %v2535_v14 = vmul.f32 1.442695, %v2491_v51  ;;  %v2484_v52 = vsub.f32 %v5197_v24, %v5238_v9 }
 0x318   : > { %v2405_v25 = vadd.f32 %v2404_v58, %v5098_v37  ;;  %v2569_v8 = vmul.f32 1.442695, %v2508_v11  ;;  %v2553_v3 = vmul.f32 1.442695, %v2500_v59  ;;  %3344 = vpow2.f32 %v2567_v39 }
 0x319   : > { %v2463_v13 = vmax.f32 %v2462_v5, %v2376_v45  ;;  %v2537_v50 = vmul.f32 1.442695, %v2492_v16  ;;  %v2519_v63 = vmul.f32 1.442695, %v2483_v19  ;;  %v2521_v23 = vmul.f32 1.442695, %v2484_v52 }
 0x31a   : > { %v2472_v30 = vmax.f32 %v2471_v54, %v2405_v25  ;;  %3346 = vpow2.f32 %v2569_v8 }
 0x31b   : > { %v2464_v20 = vrot.slane %v2463_v13, 4  ;;  %3348 = vpow2.f32 %v2551_v32 }
 0x31c   : > { %v2473_v47 = vrot.slane %v2472_v30, 4  ;;  %3350 = vpow2.f32 %v2553_v3 }
 0x31d   : > { %v2465_v37 = vmax.f32 %v2463_v13, %v2464_v20  ;;  %3352 = vpow2.f32 %v2535_v14 }
 0x31e   : > { %v2474_v41 = vmax.f32 %v2472_v30, %v2473_v47  ;;  %3354 = vpow2.f32 %v2537_v50  ;;  %v3345_v7 = vpop.eup %3344 }
 0x31f   : > { %v2466_v15 = vrot.slane %v2465_v37, 2  ;;  %3356 = vpow2.f32 %v2519_v63  ;;  %2672 = vmatpush.msrb.mxu0 %v3345_v7 }
 0x320   : > { %v2475_v43 = vrot.slane %v2474_v41, 2  ;;  %v3347_v49 = vpop.eup %3346  ;;  %3358 = vpow2.f32 %v2521_v23 }
 0x321   : > { %v2467_v6 = vmax.f32 %v2465_v37, %v2466_v15  ;;  %v3349_v24 = vpop.eup %3348  ;;  %2692 = vmatpush.msrb.mxu1 %v3347_v49 }
 0x322   : > { %v2476_v28 = vmax.f32 %v2474_v41, %v2475_v43  ;;  %v3351_v17 = vpop.eup %3350  ;;  %2673 = vmatpush.msrb.mxu0 %v3349_v24 }
 0x323   : > { %v2468_v60 = vrot.slane %v2467_v6, 1  ;;  %v3353_v33 = vpop.eup %3352  ;;  %2693 = vmatpush.msrb.mxu1 %v3351_v17 }
 0x324   : > { %v2477_v29 = vrot.slane %v2476_v28, 1  ;;  %v3355_v26 = vpop.eup %3354  ;;  %2674 = vmatpush.msrb.mxu0 %v3353_v33 }
 0x325   : > { %v5258_v62 = vmax.f32 %v2467_v6, %v2468_v60  ;;  %v3357_v2 = vpop.eup %3356  ;;  %2694 = vmatpush.msrb.mxu1 %v3355_v26 }
 0x326   : > { %v5260_v22 = vmax.f32 %v2476_v28, %v2477_v29  ;;  %v3359_v44 = vpop.eup %3358  ;;  %2675 = vmatpush.msrb.mxu0 %v3357_v2 }
 0x327   : > { %v2509_v34 = vsub.f32 %v2376_v45, %v5258_v62  ;;  %v2501_v18 = vsub.f32 %v5224_v4, %v5258_v62  ;;  %v2493_v10 = vsub.f32 %v5215_v1, %v5258_v62  ;;  %2695 = vmatpush.msrb.mxu1 %v3359_v44  ;;  %3088 = vmatmul.msk.f32.vlgmr.msrb.gmra.mxu0 %vm2576_vm7, %v5157_v61 }
 0x328   : > { %v2510_v42 = vsub.f32 %v2405_v25, %v5260_v22  ;;  %v2502_v36 = vsub.f32 %v5230_v0, %v5260_v22  ;;  %v2494_v56 = vsub.f32 %v5218_v55, %v5260_v22  ;;  %3089 = vmatmul.msk.f32.vlgmr.msrb.gmra.mxu1 %vm2576_vm7, %v5157_v61  ;;  %v2485_v1 = vsub.f32 %v5221_v21, %v5258_v62 }
 0x329   : > { %v2571_v27 = vmul.f32 1.442695, %v2509_v34  ;;  %v2555_v4 = vmul.f32 1.442695, %v2501_v18  ;;  %v2486_v54 = vsub.f32 %v5227_v57, %v5260_v22  ;;  %v2539_v31 = vmul.f32 1.442695, %v2493_v10 }
 0x32a   : > { %v2573_v5 = vmul.f32 1.442695, %v2510_v42  ;;  %v2557_v53 = vmul.f32 1.442695, %v2502_v36  ;;  %v2541_v0 = vmul.f32 1.442695, %v2494_v56 }
 0x32b   : > { %3360 = vpow2.f32 %v2571_v27  ;;  %v2523_v46 = vmul.f32 1.442695, %v2485_v1  ;;  %v2525_v55 = vmul.f32 1.442695, %v2486_v54 }
 0x32c   : > { %3362 = vpow2.f32 %v2573_v5 }
 0x32d   : > { %3364 = vpow2.f32 %v2555_v4 }
 0x32e   : > { %3366 = vpow2.f32 %v2557_v53 }
 0x32f   : > { %3368 = vpow2.f32 %v2539_v31 }
 0x330   : > { %3370 = vpow2.f32 %v2541_v0 }
 0x331   : > { %v3361_v51 = vpop.eup %3360  ;;  %3372 = vpow2.f32 %v2523_v46 }
 0x332   : > { %v3363_v11 = vpop.eup %3362  ;;  %2712 = vmatpush.msrb.mxu2 %v3361_v51  ;;  %3374 = vpow2.f32 %v2525_v55 }
 0x333   : > { %v3365_v21 = vpop.eup %3364  ;;  %2732 = vmatpush.msrb.mxu3 %v3363_v11 }
 0x334   : > { %v3367_v45 = vpop.eup %3366  ;;  %2713 = vmatpush.msrb.mxu2 %v3365_v21 }
 0x335   : > { %v3369_v57 = vpop.eup %3368  ;;  %2733 = vmatpush.msrb.mxu3 %v3367_v45 }
 0x336   : > { %v3371_v58 = vpop.eup %3370  ;;  %2714 = vmatpush.msrb.mxu2 %v3369_v57 }
 0x337   : > { %v3373_v59 = vpop.eup %3372  ;;  %2734 = vmatpush.msrb.mxu3 %v3371_v58 }
 0x338   : > { %v3375_v16 = vpop.eup %3374  ;;  %2715 = vmatpush.msrb.mxu2 %v3373_v59 }
 0x339   : > { %2735 = vmatpush.msrb.mxu3 %v3375_v16  ;;  %3090 = vmatmul.msk.f32.vlgmr.msrb.gmra.mxu2 %vm2576_vm7, %v5157_v61 }
 0x33a   : > { %3091 = vmatmul.msk.f32.vlgmr.msrb.gmra.mxu3 %vm2576_vm7, %v5157_v61 }
 0x373   : > { %v2597_v39 = vpop.f32.mrf.mxu0 }
 0x374   : > { %3376 = vlog2.f32 %v2597_v39 }
 0x375   : > { %v2617_v25 = vpop.f32.mrf.mxu1 }
 0x376   : > { %3378 = vlog2.f32 %v2617_v25 }
 0x37a   : > { %v3377_v32 = vpop.eup %3376 }
 0x37b   : > { %v2741_v19 = vmul.f32 0.6931472, %v3377_v32 }
 0x37c   : > { %v3379_v8 = vpop.eup %3378 }
 0x37d   : > { %v2756_v13 = vadd.f32 %v2741_v19, %v5119_v40  ;;  %v2743_v3 = vmul.f32 0.6931472, %v3379_v8 }
 0x37f   : > { %2764 = vst [vmem:[%s5286_s25] sm:$0xff] %v2756_v13  ;;  %v2757_v61 = vadd.f32 %v2743_v3, %v5130_v48 }
 0x381   : > { %2765 = vst [vmem:[%s5286_s25 + $0x8] sm:$0xff] %v2757_v61 }
 0x38c   : > { %v2637_v30 = vpop.f32.mrf.mxu2 }
 0x38d   : > { %3380 = vlog2.f32 %v2637_v30  ;;  %v2657_v14 = vpop.f32.mrf.mxu3 }
 0x38e   : > { %3382 = vlog2.f32 %v2657_v14 }
 0x393   : > { %v3381_v52 = vpop.eup %3380 }
 0x394   : > { %v3383_v20 = vpop.eup %3382  ;;  %v2745_v50 = vmul.f32 0.6931472, %v3381_v52 }
 0x395   : > { %v2747_v40 = vmul.f32 0.6931472, %v3383_v20 }
 0x396   : > { %v2758_v47 = vadd.f32 %v2745_v50, %v5159_v38 }
 0x397   : > { %v2759_v63 = vadd.f32 %v2747_v40, %v5161_v35 }
 0x398   : > { %2766 = vst [vmem:[%s5286_s25 + $0x10] sm:$0xff] %v2758_v47 }
 0x399   : > { %2767 = vst [vmem:[%s5286_s25 + $0x18] sm:$0xff] %v2759_v63 }
 0x3a4   : > { %v2677_v37 = vpop.f32.mrf.mxu0 }
 0x3a5   : > { %3384 = vlog2.f32 %v2677_v37  ;;  %v2697_v48 = vpop.f32.mrf.mxu1 }
 0x3a6   : > { %3386 = vlog2.f32 %v2697_v48 }
 0x3ab   : > { %v3385_v23 = vpop.eup %3384 }
 0x3ac   : > { %v3387_v41 = vpop.eup %3386  ;;  %v2749_v15 = vmul.f32 0.6931472, %v3385_v23 }
 0x3ad   : > { %v2751_v7 = vmul.f32 0.6931472, %v3387_v41 }
 0x3ae   : > { %v2760_v43 = vadd.f32 %v2749_v15, %v5234_v12 }
 0x3af   : > { %v2761_v49 = vadd.f32 %v2751_v7, %v5238_v9 }
 0x3b0   : > { %2768 = vst [vmem:[%s5286_s25 + $0x20] sm:$0xff] %v2760_v43 }
 0x3b1   : > { %2769 = vst [vmem:[%s5286_s25 + $0x28] sm:$0xff] %v2761_v49 }
 0x3bc   : > { %v2717_v38 = vpop.f32.mrf.mxu2 }
 0x3bd   : > { %3388 = vlog2.f32 %v2717_v38  ;;  %v2737_v35 = vpop.f32.mrf.mxu3 }
 0x3be   : > { %3390 = vlog2.f32 %v2737_v35 }
 0x3c3   : > { %v3389_v6 = vpop.eup %3388 }
 0x3c4   : > { %v3391_v24 = vpop.eup %3390  ;;  %v2753_v12 = vmul.f32 0.6931472, %v3389_v6 }
 0x3c5   : > { %v2755_v9 = vmul.f32 0.6931472, %v3391_v24 }
 0x3c6   : > { %v2762_v28 = vadd.f32 %v2753_v12, %v5258_v62 }
 0x3c7   : > { %v2763_v17 = vadd.f32 %v2755_v9, %v5260_v22 }
 0x3c8   : > { %2770 = vst [vmem:[%s5286_s25 + $0x30] sm:$0xff] %v2762_v28 }
 0x3c9   : > { %2771 = vst [vmem:[%s5286_s25 + $0x38] sm:$0xff] %v2763_v17 }
 0x3ca   : > { %3449 = shalt.err (!%p3446_p7)
}
 0x3cb   : > { %3101 = dma.vmem_to_hbm [thread:$0]  (%p3589_p11), %s2787_s15, 1024, %s2789_s23, %s2773_s9  }
 0x3cc PF: > { %s2800_s20 = sand.u32 1, %s3476_s27   ;;  %p3108_p8 = pnand %p2861_p9, %p3593_p12 }
 0x3cd   : > { %s2801_s25 = scalar_lea.sflag [#allocation4], %s2800_s20 }
 0x3ce   : > { %p3109_p10 = pneg %p3108_p8 }
 0x3d0   : > { %3471 = dma.done.wait (%p3109_p10), %s2801_s25, 1024  }
 0x3d1   : > { %3473 = vsyncadd (%p3109_p10), %s2801_s25, 4294966272  ;;  %s5526_s10 = sld [smem:[#allocation8_spill]]  ;;  %p21_p1 = scmp.ge.s32.totalorder %s3564_s11, 4  }
 0x3d2   : > { %s5527_s29 = sld [smem:[#allocation9_spill]]  ;;  %s5528_s27 = smov %s3480_s28 }
 0x3d3   : > { %s5530_s30 = smov %s3564_s11  ;;  %23 = sbr.rel (!%p21_p1) target bundleno = 5 (0x5), region = 97 }
 0x3d7   : > { %s5529_s28 = smov %s5526_s10 }
 0x3d8   :  { %2807 = vsyncpa [#allocation3], 1 }
 0x3d9   :  { %2809 = vsyncpa [#allocation3 + $0x1], 1 }
 0x3da   :  { %2810 = vsyncpa [#allocation4], 1 }
 0x3db   :  { %2812 = vsyncpa [#allocation4 + $0x1], 1 }

</bundles_post_ra>
